<compile_context>
chip_gen: v5e
topology: v5e:2x2
jax: 0.10.0
libtpu: 0.0.40
codegen_flags: <defaults>
</compile_context>

<pallas_src>
import functools

import jax
import jax.numpy as jnp
import numpy as np
from jax import lax
from jax.experimental import pallas as pl
from jax.experimental.pallas import tpu as pltpu


# ---------------------------------------------------------------------------
# Pass 1: banded conv matmul + fused BN partial-stat epilogue (one image / step)
# ---------------------------------------------------------------------------
def _conv_stats_kernel(x_ref, w_ref, o_ref, sum_ref, ssq_ref):
    """x_ref:   (1, H+2p, (W+2p)*Cin)        bf16  zero-padded input rows
       w_ref:   (Cp, KH, (W+2p)*Cin, r*W*r)  bf16  banded, channel-major filter
       o_ref:   (1, Cp, H, r*W*r)            bf16  conv out, pixel-shuffle-ready
       sum/ssq: (1, Cp, r*W*r)               f32   per-column partial BN stats"""
    cp, kh_taps, _, _ = w_ref.shape
    th = o_ref.shape[2]
    for c in range(cp):
        acc = jnp.dot(x_ref[0, 0:th, :], w_ref[c, 0],
                      preferred_element_type=jnp.float32)
        for kh in range(1, kh_taps):
            acc += jnp.dot(x_ref[0, kh:kh + th, :], w_ref[c, kh],
                           preferred_element_type=jnp.float32)
        o_ref[0, c] = acc.astype(o_ref.dtype)
        # Stats from the f32 accumulator (exact), before the bf16 store.
        sum_ref[0, c:c + 1, :] = jnp.sum(acc, axis=0, keepdims=True)
        ssq_ref[0, c:c + 1, :] = jnp.sum(acc * acc, axis=0, keepdims=True)


def conv_matmul_with_stats(xp_rows, w_band):
    N, THp, WpCin = xp_rows.shape
    Cp, KH, _, RWr = w_band.shape
    TH = THp - (KH - 1)
    cost = pl.CostEstimate(
        flops=2 * N * KH * TH * WpCin * Cp * RWr,
        transcendentals=0,
        bytes_accessed=(xp_rows.size * 2 + w_band.size * 2
                        + N * Cp * TH * RWr * 2 + 2 * N * Cp * RWr * 4))
    return pl.pallas_call(
        _conv_stats_kernel,
        out_shape=(
            jax.ShapeDtypeStruct((N, Cp, TH, RWr), jnp.bfloat16),
            jax.ShapeDtypeStruct((N, Cp, RWr), jnp.float32),
            jax.ShapeDtypeStruct((N, Cp, RWr), jnp.float32),
        ),
        grid_spec=pltpu.PrefetchScalarGridSpec(
            num_scalar_prefetch=0,
            grid=(N,),
            in_specs=[
                pl.BlockSpec((1, THp, WpCin), lambda n: (n, 0, 0)),
                pl.BlockSpec((Cp, KH, WpCin, RWr), lambda n: (0, 0, 0, 0)),
            ],
            out_specs=[
                pl.BlockSpec((1, Cp, TH, RWr), lambda n: (n, 0, 0, 0)),
                pl.BlockSpec((1, Cp, RWr), lambda n: (n, 0, 0)),
                pl.BlockSpec((1, Cp, RWr), lambda n: (n, 0, 0)),
            ],
        ),
        compiler_params=pltpu.CompilerParams(
            dimension_semantics=("parallel",)),
        cost_estimate=cost,
    )(xp_rows, w_band)


# ---------------------------------------------------------------------------
# Pass 2: folded BN affine + PReLU on the pixel-shuffle-ready layout
# ---------------------------------------------------------------------------
def _affine_prelu_kernel(scale_ref, shift_ref, alpha_ref, x_ref, o_ref):
    """scale/shift: SMEM (Cp,) f32 ; alpha: SMEM (1,) f32
       x_ref: (1, Cp, H, r*W*r) bf16 ; o_ref: (1, Cp, H, r*W*r) f32"""
    cp = x_ref.shape[1]
    a = alpha_ref[0]
    for c in range(cp):
        y = x_ref[0, c].astype(jnp.float32) * scale_ref[c] + shift_ref[c]
        o_ref[0, c] = jnp.where(y >= 0.0, y, a * y)


def affine_prelu(conv_act, scale_c, shift_c, alpha):
    N, Cp, TH, RWr = conv_act.shape
    cost = pl.CostEstimate(
        flops=4 * conv_act.size, transcendentals=0,
        bytes_accessed=conv_act.size * 2 + conv_act.size * 4 + (2 * Cp + 1) * 4)
    return pl.pallas_call(
        _affine_prelu_kernel,
        out_shape=jax.ShapeDtypeStruct((N, Cp, TH, RWr), jnp.float32),
        grid_spec=pltpu.PrefetchScalarGridSpec(
            num_scalar_prefetch=0,
            grid=(N,),
            in_specs=[
                pl.BlockSpec(memory_space=pltpu.MemorySpace.SMEM),   # scale (Cp,)
                pl.BlockSpec(memory_space=pltpu.MemorySpace.SMEM),   # shift (Cp,)
                pl.BlockSpec(memory_space=pltpu.MemorySpace.SMEM),   # alpha (1,)
                pl.BlockSpec((1, Cp, TH, RWr), lambda n: (n, 0, 0, 0)),
            ],
            out_specs=pl.BlockSpec((1, Cp, TH, RWr), lambda n: (n, 0, 0, 0)),
        ),
        compiler_params=pltpu.CompilerParams(
            dimension_semantics=("parallel",)),
        cost_estimate=cost,
        # TODO(synk): with a bf16 output this could alias onto conv_act via
        # input_output_aliases={3: 0}; kept f32 so the module returns its native dtype.
    )(scale_c, shift_c, alpha, conv_act)


# ---------------------------------------------------------------------------
# Full module forward (hot paths in Pallas; tiny stat fold + free reshape in JAX)
# ---------------------------------------------------------------------------
@functools.partial(jax.jit, static_argnames=("upscale_factor",))
def subpixel_block_forward(x_nchw, w_oihw, gamma, beta, alpha,
                           *, upscale_factor=2, eps=1e-5):
    N, Cin, H, W = x_nchw.shape
    Cout, _, KH, KW = w_oihw.shape
    r = upscale_factor
    Cp = Cout // (r * r)
    assert Cp * r * r == Cout, "out_channels must be divisible by upscale_factor**2"
    assert KH == KW and KH % 2 == 1, "stride-1 'same' conv assumed (padding=(k-1)//2)"
    pad = (KH - 1) // 2
    Wp = W + 2 * pad
    RWr = r * W * r                      # lane width of one output-channel group

    # --- padded input rows (bf16; the input is the small HBM stream) --------------
    x_nhwc = jnp.transpose(x_nchw, (0, 2, 3, 1)).astype(jnp.float32)
    xp = jnp.pad(x_nhwc, ((0, 0), (pad, pad), (pad, pad), (0, 0)))
    xp_rows = xp.reshape(N, H + 2 * pad, Wp * Cin).astype(jnp.bfloat16)

    # --- banded filter: band[c, kh, p*Cin+ci, i*(W*r)+w*r+j] = w[c*r^2+i*r+j, ci, kh, p-w]
    #     (columns pre-permuted channel-major so pixel shuffle becomes a free reshape)
    sel = (jnp.arange(Wp)[None, None, :]
           == (jnp.arange(W)[None, :, None] + jnp.arange(KW)[:, None, None])
           ).astype(jnp.float32)                                     # (KW, W, Wp)
    wt = jnp.transpose(w_oihw, (2, 3, 1, 0)).astype(jnp.float32)     # (KH,KW,Cin,Cout)
    wt = wt.reshape(KH, KW, Cin, Cp, r, r)
    band = jnp.einsum("qwp,hqzcij->chpziwj", sel, wt)
    band = band.reshape(Cp, KH, Wp * Cin, RWr).astype(jnp.bfloat16)

    conv_act, sums, ssqs = conv_matmul_with_stats(xp_rows, band)

    # --- fold BN batch stats (pooled over batch, space and the r^2 sub-channels) ---
    ch_sum = jnp.sum(sums, axis=(0, 2))                              # (Cp,)
    ch_ssq = jnp.sum(ssqs, axis=(0, 2))
    count = float(N * H * W * r * r)
    mean = ch_sum / count
    # TODO(synk): one-pass E[x^2]-mean^2 in f32; use a mean-shifted / Welford
    # accumulation if production activations have |mean| >> std.
    var = jnp.maximum(ch_ssq / count - mean * mean, 0.0)             # biased, like PyTorch BN
    scale_c = gamma.astype(jnp.float32) * lax.rsqrt(var + eps)
    shift_c = beta.astype(jnp.float32) - mean * scale_c

    out = affine_prelu(conv_act, scale_c, shift_c,
                       alpha.reshape(1).astype(jnp.float32))
    # Pixel shuffle + NCHW: free reshape (row-major contiguous), no XLA transpose pass.
    return out.reshape(N, Cp, H * r, W * r)


# ---------------------------------------------------------------------------
# Pure-JAX reference (mirrors the PyTorch forward in default train mode)
# ---------------------------------------------------------------------------
def reference_forward(x_nchw, w_oihw, gamma, beta, alpha,
                      *, upscale_factor=2, eps=1e-5):
    y = lax.conv_general_dilated(
        x_nchw, w_oihw, window_strides=(1, 1), padding=((1, 1), (1, 1)),
        dimension_numbers=("NCHW", "OIHW", "NCHW"))
    N, C, H, W = y.shape
    r = upscale_factor
    Cp = C // (r * r)
    y = y.reshape(N, Cp, r, r, H, W)
    y = jnp.transpose(y, (0, 1, 4, 2, 5, 3)).reshape(N, Cp, H * r, W * r)
    mean = y.mean(axis=(0, 2, 3), keepdims=True)
    var = ((y - mean) ** 2).mean(axis=(0, 2, 3), keepdims=True)
    yh = (y - mean) / jnp.sqrt(var + eps)
    yb = yh * gamma.reshape(1, Cp, 1, 1) + beta.reshape(1, Cp, 1, 1)
    return jnp.where(yb >= 0, yb, alpha * yb)


if __name__ == "__main__":
    # in_channels=4, out_channels=16, kernel_size=3, stride=1, padding=1, bias=False,
    # upscale_factor=2 (post-shuffle channels == in_channels == 4).
    N, Cin, H, W = 2, 4, 16, 16
    Cout, K = 16, 3

    key = jax.random.PRNGKey(0)
    kx, kw = jax.random.split(key)
    x = jax.random.normal(kx, (N, Cin, H, W), dtype=jnp.float32)
    w = jax.random.normal(kw, (Cout, Cin, K, K), dtype=jnp.float32) * 0.1
    # BatchNorm2d defaults: gamma=1, beta=0; PReLU default single param 0.25.
    gamma = jnp.ones((Cin,), dtype=jnp.float32)
    beta = jnp.zeros((Cin,), dtype=jnp.float32)
    alpha = jnp.array(0.25, dtype=jnp.float32)

    out = jax.block_until_ready(subpixel_block_forward(x, w, gamma, beta, alpha))
    ref = jax.block_until_ready(reference_forward(x, w, gamma, beta, alpha))
    assert out.shape == (N, Cin, H * 2, W * 2), out.shape
    # bf16 matmul inputs / bf16 activation storage (f32 accumulation & stats):
    # tolerance loosened per review.
    np.testing.assert_allclose(np.asarray(out), np.asarray(ref),
                               rtol=2e-2, atol=2e-2)
    print("KERNEL_OK")
</pallas_src>

<mosaic_0001>
module attributes {stable_mosaic.version = 11 : i64} {
  func.func @_conv_stats_kernel(%arg0: i32, %arg1: memref<1x18x72xbf16, #tpu.memory_space<vmem>>, %arg2: memref<4x3x72x64xbf16, #tpu.memory_space<vmem>>, %arg3: memref<1x4x16x64xbf16, #tpu.memory_space<vmem>>, %arg4: memref<1x4x64xf32, #tpu.memory_space<vmem>>, %arg5: memref<1x4x64xf32, #tpu.memory_space<vmem>>) attributes {dimension_semantics = [#tpu.dimension_semantics<parallel>], iteration_bounds = array<i64: 2>, scalar_prefetch = 0 : i64, scratch_operands = 0 : i64, tpu.core_type = #tpu.core_type<tc>, window_params = [{transform_indices = @transform_0, window_bounds = array<i64: 1, 18, 72>}, {pipeline_mode = #tpu.pipeline_mode<synchronous>, transform_indices = @transform_1, window_bounds = array<i64: 4, 3, 72, 64>}, {transform_indices = @transform_2, window_bounds = array<i64: 1, 4, 16, 64>}, {transform_indices = @transform_3, window_bounds = array<i64: 1, 4, 64>}, {transform_indices = @transform_4, window_bounds = array<i64: 1, 4, 64>}]} {
    %c0 = arith.constant 0 : index
    %c0_0 = arith.constant 0 : index
    %c0_1 = arith.constant 0 : index
    %0 = vector.load %arg1[%c0, %c0_0, %c0_1] : memref<1x18x72xbf16, #tpu.memory_space<vmem>>, vector<1x16x72xbf16>
    %1 = vector.shape_cast %0 : vector<1x16x72xbf16> to vector<16x72xbf16>
    %c0_2 = arith.constant 0 : index
    %c0_3 = arith.constant 0 : index
    %c0_4 = arith.constant 0 : index
    %c0_5 = arith.constant 0 : index
    %2 = vector.load %arg2[%c0_2, %c0_3, %c0_4, %c0_5] : memref<4x3x72x64xbf16, #tpu.memory_space<vmem>>, vector<1x1x72x64xbf16>
    %3 = vector.shape_cast %2 : vector<1x1x72x64xbf16> to vector<72x64xbf16>
    %cst = arith.constant dense<0.000000e+00> : vector<16x64xf32>
    %4 = tpu.matmul %1, %3, %cst {dimension_numbers = #tpu.dot_dimension_numbers<[1], [0], [0], [1], [0, 0, 1, 1], [], []>} : vector<16x72xbf16>, vector<72x64xbf16>, vector<16x64xf32> -> vector<16x64xf32>
    %c0_6 = arith.constant 0 : index
    %c1 = arith.constant 1 : index
    %c0_7 = arith.constant 0 : index
    %5 = vector.load %arg1[%c0_6, %c1, %c0_7] : memref<1x18x72xbf16, #tpu.memory_space<vmem>>, vector<1x16x72xbf16>
    %6 = vector.shape_cast %5 : vector<1x16x72xbf16> to vector<16x72xbf16>
    %c0_8 = arith.constant 0 : index
    %c1_9 = arith.constant 1 : index
    %c0_10 = arith.constant 0 : index
    %c0_11 = arith.constant 0 : index
    %7 = vector.load %arg2[%c0_8, %c1_9, %c0_10, %c0_11] : memref<4x3x72x64xbf16, #tpu.memory_space<vmem>>, vector<1x1x72x64xbf16>
    %8 = vector.shape_cast %7 : vector<1x1x72x64xbf16> to vector<72x64xbf16>
    %cst_12 = arith.constant dense<0.000000e+00> : vector<16x64xf32>
    %9 = tpu.matmul %6, %8, %cst_12 {dimension_numbers = #tpu.dot_dimension_numbers<[1], [0], [0], [1], [0, 0, 1, 1], [], []>} : vector<16x72xbf16>, vector<72x64xbf16>, vector<16x64xf32> -> vector<16x64xf32>
    %10 = arith.addf %4, %9 : vector<16x64xf32>
    %c0_13 = arith.constant 0 : index
    %c2 = arith.constant 2 : index
    %c0_14 = arith.constant 0 : index
    %11 = vector.load %arg1[%c0_13, %c2, %c0_14] : memref<1x18x72xbf16, #tpu.memory_space<vmem>>, vector<1x16x72xbf16>
    %12 = vector.shape_cast %11 : vector<1x16x72xbf16> to vector<16x72xbf16>
    %c0_15 = arith.constant 0 : index
    %c2_16 = arith.constant 2 : index
    %c0_17 = arith.constant 0 : index
    %c0_18 = arith.constant 0 : index
    %13 = vector.load %arg2[%c0_15, %c2_16, %c0_17, %c0_18] : memref<4x3x72x64xbf16, #tpu.memory_space<vmem>>, vector<1x1x72x64xbf16>
    %14 = vector.shape_cast %13 : vector<1x1x72x64xbf16> to vector<72x64xbf16>
    %cst_19 = arith.constant dense<0.000000e+00> : vector<16x64xf32>
    %15 = tpu.matmul %12, %14, %cst_19 {dimension_numbers = #tpu.dot_dimension_numbers<[1], [0], [0], [1], [0, 0, 1, 1], [], []>} : vector<16x72xbf16>, vector<72x64xbf16>, vector<16x64xf32> -> vector<16x64xf32>
    %16 = arith.addf %10, %15 : vector<16x64xf32>
    %17 = arith.truncf %16 : vector<16x64xf32> to vector<16x64xbf16>
    %c0_20 = arith.constant 0 : index
    %c0_21 = arith.constant 0 : index
    %c0_22 = arith.constant 0 : index
    %c0_23 = arith.constant 0 : index
    %18 = vector.load %arg3[%c0_20, %c0_21, %c0_22, %c0_23] : memref<1x4x16x64xbf16, #tpu.memory_space<vmem>>, vector<1x1x16x64xbf16>
    %19 = vector.shape_cast %18 : vector<1x1x16x64xbf16> to vector<16x64xbf16>
    %20 = vector.shape_cast %17 : vector<16x64xbf16> to vector<1x1x16x64xbf16>
    tpu.vector_store %arg3[%c0_20, %c0_21, %c0_22, %c0_23], %20 {strides = array<i32>} : memref<1x4x16x64xbf16, #tpu.memory_space<vmem>>, vector<1x1x16x64xbf16>,
    %cst_24 = arith.constant dense<0.000000e+00> : vector<64xf32>
    %21 = vector.multi_reduction <add>, %16, %cst_24 [0] : vector<16x64xf32> to vector<64xf32>
    %22 = vector.shape_cast %21 : vector<64xf32> to vector<1x64xf32>
    %c0_25 = arith.constant 0 : index
    %c0_26 = arith.constant 0 : index
    %c0_27 = arith.constant 0 : index
    %23 = vector.load %arg4[%c0_25, %c0_26, %c0_27] : memref<1x4x64xf32, #tpu.memory_space<vmem>>, vector<1x1x64xf32>
    %24 = vector.shape_cast %23 : vector<1x1x64xf32> to vector<1x64xf32>
    %25 = vector.shape_cast %22 : vector<1x64xf32> to vector<1x1x64xf32>
    tpu.vector_store %arg4[%c0_25, %c0_26, %c0_27], %25 {strides = array<i32>} : memref<1x4x64xf32, #tpu.memory_space<vmem>>, vector<1x1x64xf32>,
    %26 = arith.mulf %16, %16 : vector<16x64xf32>
    %cst_28 = arith.constant dense<0.000000e+00> : vector<64xf32>
    %27 = vector.multi_reduction <add>, %26, %cst_28 [0] : vector<16x64xf32> to vector<64xf32>
    %28 = vector.shape_cast %27 : vector<64xf32> to vector<1x64xf32>
    %c0_29 = arith.constant 0 : index
    %c0_30 = arith.constant 0 : index
    %c0_31 = arith.constant 0 : index
    %29 = vector.load %arg5[%c0_29, %c0_30, %c0_31] : memref<1x4x64xf32, #tpu.memory_space<vmem>>, vector<1x1x64xf32>
    %30 = vector.shape_cast %29 : vector<1x1x64xf32> to vector<1x64xf32>
    %31 = vector.shape_cast %28 : vector<1x64xf32> to vector<1x1x64xf32>
    tpu.vector_store %arg5[%c0_29, %c0_30, %c0_31], %31 {strides = array<i32>} : memref<1x4x64xf32, #tpu.memory_space<vmem>>, vector<1x1x64xf32>,
    %c0_32 = arith.constant 0 : index
    %c0_33 = arith.constant 0 : index
    %c0_34 = arith.constant 0 : index
    %32 = vector.load %arg1[%c0_32, %c0_33, %c0_34] : memref<1x18x72xbf16, #tpu.memory_space<vmem>>, vector<1x16x72xbf16>
    %33 = vector.shape_cast %32 : vector<1x16x72xbf16> to vector<16x72xbf16>
    %c1_35 = arith.constant 1 : index
    %c0_36 = arith.constant 0 : index
    %c0_37 = arith.constant 0 : index
    %c0_38 = arith.constant 0 : index
    %34 = vector.load %arg2[%c1_35, %c0_36, %c0_37, %c0_38] : memref<4x3x72x64xbf16, #tpu.memory_space<vmem>>, vector<1x1x72x64xbf16>
    %35 = vector.shape_cast %34 : vector<1x1x72x64xbf16> to vector<72x64xbf16>
    %cst_39 = arith.constant dense<0.000000e+00> : vector<16x64xf32>
    %36 = tpu.matmul %33, %35, %cst_39 {dimension_numbers = #tpu.dot_dimension_numbers<[1], [0], [0], [1], [0, 0, 1, 1], [], []>} : vector<16x72xbf16>, vector<72x64xbf16>, vector<16x64xf32> -> vector<16x64xf32>
    %c0_40 = arith.constant 0 : index
    %c1_41 = arith.constant 1 : index
    %c0_42 = arith.constant 0 : index
    %37 = vector.load %arg1[%c0_40, %c1_41, %c0_42] : memref<1x18x72xbf16, #tpu.memory_space<vmem>>, vector<1x16x72xbf16>
    %38 = vector.shape_cast %37 : vector<1x16x72xbf16> to vector<16x72xbf16>
    %c1_43 = arith.constant 1 : index
    %c1_44 = arith.constant 1 : index
    %c0_45 = arith.constant 0 : index
    %c0_46 = arith.constant 0 : index
    %39 = vector.load %arg2[%c1_43, %c1_44, %c0_45, %c0_46] : memref<4x3x72x64xbf16, #tpu.memory_space<vmem>>, vector<1x1x72x64xbf16>
    %40 = vector.shape_cast %39 : vector<1x1x72x64xbf16> to vector<72x64xbf16>
    %cst_47 = arith.constant dense<0.000000e+00> : vector<16x64xf32>
    %41 = tpu.matmul %38, %40, %cst_47 {dimension_numbers = #tpu.dot_dimension_numbers<[1], [0], [0], [1], [0, 0, 1, 1], [], []>} : vector<16x72xbf16>, vector<72x64xbf16>, vector<16x64xf32> -> vector<16x64xf32>
    %42 = arith.addf %36, %41 : vector<16x64xf32>
    %c0_48 = arith.constant 0 : index
    %c2_49 = arith.constant 2 : index
    %c0_50 = arith.constant 0 : index
    %43 = vector.load %arg1[%c0_48, %c2_49, %c0_50] : memref<1x18x72xbf16, #tpu.memory_space<vmem>>, vector<1x16x72xbf16>
    %44 = vector.shape_cast %43 : vector<1x16x72xbf16> to vector<16x72xbf16>
    %c1_51 = arith.constant 1 : index
    %c2_52 = arith.constant 2 : index
    %c0_53 = arith.constant 0 : index
    %c0_54 = arith.constant 0 : index
    %45 = vector.load %arg2[%c1_51, %c2_52, %c0_53, %c0_54] : memref<4x3x72x64xbf16, #tpu.memory_space<vmem>>, vector<1x1x72x64xbf16>
    %46 = vector.shape_cast %45 : vector<1x1x72x64xbf16> to vector<72x64xbf16>
    %cst_55 = arith.constant dense<0.000000e+00> : vector<16x64xf32>
    %47 = tpu.matmul %44, %46, %cst_55 {dimension_numbers = #tpu.dot_dimension_numbers<[1], [0], [0], [1], [0, 0, 1, 1], [], []>} : vector<16x72xbf16>, vector<72x64xbf16>, vector<16x64xf32> -> vector<16x64xf32>
    %48 = arith.addf %42, %47 : vector<16x64xf32>
    %49 = arith.truncf %48 : vector<16x64xf32> to vector<16x64xbf16>
    %c0_56 = arith.constant 0 : index
    %c1_57 = arith.constant 1 : index
    %c0_58 = arith.constant 0 : index
    %c0_59 = arith.constant 0 : index
    %50 = vector.load %arg3[%c0_56, %c1_57, %c0_58, %c0_59] : memref<1x4x16x64xbf16, #tpu.memory_space<vmem>>, vector<1x1x16x64xbf16>
    %51 = vector.shape_cast %50 : vector<1x1x16x64xbf16> to vector<16x64xbf16>
    %52 = vector.shape_cast %49 : vector<16x64xbf16> to vector<1x1x16x64xbf16>
    tpu.vector_store %arg3[%c0_56, %c1_57, %c0_58, %c0_59], %52 {strides = array<i32>} : memref<1x4x16x64xbf16, #tpu.memory_space<vmem>>, vector<1x1x16x64xbf16>,
    %cst_60 = arith.constant dense<0.000000e+00> : vector<64xf32>
    %53 = vector.multi_reduction <add>, %48, %cst_60 [0] : vector<16x64xf32> to vector<64xf32>
    %54 = vector.shape_cast %53 : vector<64xf32> to vector<1x64xf32>
    %c0_61 = arith.constant 0 : index
    %c1_62 = arith.constant 1 : index
    %c0_63 = arith.constant 0 : index
    %55 = vector.load %arg4[%c0_61, %c1_62, %c0_63] : memref<1x4x64xf32, #tpu.memory_space<vmem>>, vector<1x1x64xf32>
    %56 = vector.shape_cast %55 : vector<1x1x64xf32> to vector<1x64xf32>
    %57 = vector.shape_cast %54 : vector<1x64xf32> to vector<1x1x64xf32>
    tpu.vector_store %arg4[%c0_61, %c1_62, %c0_63], %57 {strides = array<i32>} : memref<1x4x64xf32, #tpu.memory_space<vmem>>, vector<1x1x64xf32>,
    %58 = arith.mulf %48, %48 : vector<16x64xf32>
    %cst_64 = arith.constant dense<0.000000e+00> : vector<64xf32>
    %59 = vector.multi_reduction <add>, %58, %cst_64 [0] : vector<16x64xf32> to vector<64xf32>
    %60 = vector.shape_cast %59 : vector<64xf32> to vector<1x64xf32>
    %c0_65 = arith.constant 0 : index
    %c1_66 = arith.constant 1 : index
    %c0_67 = arith.constant 0 : index
    %61 = vector.load %arg5[%c0_65, %c1_66, %c0_67] : memref<1x4x64xf32, #tpu.memory_space<vmem>>, vector<1x1x64xf32>
    %62 = vector.shape_cast %61 : vector<1x1x64xf32> to vector<1x64xf32>
    %63 = vector.shape_cast %60 : vector<1x64xf32> to vector<1x1x64xf32>
    tpu.vector_store %arg5[%c0_65, %c1_66, %c0_67], %63 {strides = array<i32>} : memref<1x4x64xf32, #tpu.memory_space<vmem>>, vector<1x1x64xf32>,
    %c0_68 = arith.constant 0 : index
    %c0_69 = arith.constant 0 : index
    %c0_70 = arith.constant 0 : index
    %64 = vector.load %arg1[%c0_68, %c0_69, %c0_70] : memref<1x18x72xbf16, #tpu.memory_space<vmem>>, vector<1x16x72xbf16>
    %65 = vector.shape_cast %64 : vector<1x16x72xbf16> to vector<16x72xbf16>
    %c2_71 = arith.constant 2 : index
    %c0_72 = arith.constant 0 : index
    %c0_73 = arith.constant 0 : index
    %c0_74 = arith.constant 0 : index
    %66 = vector.load %arg2[%c2_71, %c0_72, %c0_73, %c0_74] : memref<4x3x72x64xbf16, #tpu.memory_space<vmem>>, vector<1x1x72x64xbf16>
    %67 = vector.shape_cast %66 : vector<1x1x72x64xbf16> to vector<72x64xbf16>
    %cst_75 = arith.constant dense<0.000000e+00> : vector<16x64xf32>
    %68 = tpu.matmul %65, %67, %cst_75 {dimension_numbers = #tpu.dot_dimension_numbers<[1], [0], [0], [1], [0, 0, 1, 1], [], []>} : vector<16x72xbf16>, vector<72x64xbf16>, vector<16x64xf32> -> vector<16x64xf32>
    %c0_76 = arith.constant 0 : index
    %c1_77 = arith.constant 1 : index
    %c0_78 = arith.constant 0 : index
    %69 = vector.load %arg1[%c0_76, %c1_77, %c0_78] : memref<1x18x72xbf16, #tpu.memory_space<vmem>>, vector<1x16x72xbf16>
    %70 = vector.shape_cast %69 : vector<1x16x72xbf16> to vector<16x72xbf16>
    %c2_79 = arith.constant 2 : index
    %c1_80 = arith.constant 1 : index
    %c0_81 = arith.constant 0 : index
    %c0_82 = arith.constant 0 : index
    %71 = vector.load %arg2[%c2_79, %c1_80, %c0_81, %c0_82] : memref<4x3x72x64xbf16, #tpu.memory_space<vmem>>, vector<1x1x72x64xbf16>
    %72 = vector.shape_cast %71 : vector<1x1x72x64xbf16> to vector<72x64xbf16>
    %cst_83 = arith.constant dense<0.000000e+00> : vector<16x64xf32>
    %73 = tpu.matmul %70, %72, %cst_83 {dimension_numbers = #tpu.dot_dimension_numbers<[1], [0], [0], [1], [0, 0, 1, 1], [], []>} : vector<16x72xbf16>, vector<72x64xbf16>, vector<16x64xf32> -> vector<16x64xf32>
    %74 = arith.addf %68, %73 : vector<16x64xf32>
    %c0_84 = arith.constant 0 : index
    %c2_85 = arith.constant 2 : index
    %c0_86 = arith.constant 0 : index
    %75 = vector.load %arg1[%c0_84, %c2_85, %c0_86] : memref<1x18x72xbf16, #tpu.memory_space<vmem>>, vector<1x16x72xbf16>
    %76 = vector.shape_cast %75 : vector<1x16x72xbf16> to vector<16x72xbf16>
    %c2_87 = arith.constant 2 : index
    %c2_88 = arith.constant 2 : index
    %c0_89 = arith.constant 0 : index
    %c0_90 = arith.constant 0 : index
    %77 = vector.load %arg2[%c2_87, %c2_88, %c0_89, %c0_90] : memref<4x3x72x64xbf16, #tpu.memory_space<vmem>>, vector<1x1x72x64xbf16>
    %78 = vector.shape_cast %77 : vector<1x1x72x64xbf16> to vector<72x64xbf16>
    %cst_91 = arith.constant dense<0.000000e+00> : vector<16x64xf32>
    %79 = tpu.matmul %76, %78, %cst_91 {dimension_numbers = #tpu.dot_dimension_numbers<[1], [0], [0], [1], [0, 0, 1, 1], [], []>} : vector<16x72xbf16>, vector<72x64xbf16>, vector<16x64xf32> -> vector<16x64xf32>
    %80 = arith.addf %74, %79 : vector<16x64xf32>
    %81 = arith.truncf %80 : vector<16x64xf32> to vector<16x64xbf16>
    %c0_92 = arith.constant 0 : index
    %c2_93 = arith.constant 2 : index
    %c0_94 = arith.constant 0 : index
    %c0_95 = arith.constant 0 : index
    %82 = vector.load %arg3[%c0_92, %c2_93, %c0_94, %c0_95] : memref<1x4x16x64xbf16, #tpu.memory_space<vmem>>, vector<1x1x16x64xbf16>
    %83 = vector.shape_cast %82 : vector<1x1x16x64xbf16> to vector<16x64xbf16>
    %84 = vector.shape_cast %81 : vector<16x64xbf16> to vector<1x1x16x64xbf16>
    tpu.vector_store %arg3[%c0_92, %c2_93, %c0_94, %c0_95], %84 {strides = array<i32>} : memref<1x4x16x64xbf16, #tpu.memory_space<vmem>>, vector<1x1x16x64xbf16>,
    %cst_96 = arith.constant dense<0.000000e+00> : vector<64xf32>
    %85 = vector.multi_reduction <add>, %80, %cst_96 [0] : vector<16x64xf32> to vector<64xf32>
    %86 = vector.shape_cast %85 : vector<64xf32> to vector<1x64xf32>
    %c0_97 = arith.constant 0 : index
    %c2_98 = arith.constant 2 : index
    %c0_99 = arith.constant 0 : index
    %87 = vector.load %arg4[%c0_97, %c2_98, %c0_99] : memref<1x4x64xf32, #tpu.memory_space<vmem>>, vector<1x1x64xf32>
    %88 = vector.shape_cast %87 : vector<1x1x64xf32> to vector<1x64xf32>
    %89 = vector.shape_cast %86 : vector<1x64xf32> to vector<1x1x64xf32>
    tpu.vector_store %arg4[%c0_97, %c2_98, %c0_99], %89 {strides = array<i32>} : memref<1x4x64xf32, #tpu.memory_space<vmem>>, vector<1x1x64xf32>,
    %90 = arith.mulf %80, %80 : vector<16x64xf32>
    %cst_100 = arith.constant dense<0.000000e+00> : vector<64xf32>
    %91 = vector.multi_reduction <add>, %90, %cst_100 [0] : vector<16x64xf32> to vector<64xf32>
    %92 = vector.shape_cast %91 : vector<64xf32> to vector<1x64xf32>
    %c0_101 = arith.constant 0 : index
    %c2_102 = arith.constant 2 : index
    %c0_103 = arith.constant 0 : index
    %93 = vector.load %arg5[%c0_101, %c2_102, %c0_103] : memref<1x4x64xf32, #tpu.memory_space<vmem>>, vector<1x1x64xf32>
    %94 = vector.shape_cast %93 : vector<1x1x64xf32> to vector<1x64xf32>
    %95 = vector.shape_cast %92 : vector<1x64xf32> to vector<1x1x64xf32>
    tpu.vector_store %arg5[%c0_101, %c2_102, %c0_103], %95 {strides = array<i32>} : memref<1x4x64xf32, #tpu.memory_space<vmem>>, vector<1x1x64xf32>,
    %c0_104 = arith.constant 0 : index
    %c0_105 = arith.constant 0 : index
    %c0_106 = arith.constant 0 : index
    %96 = vector.load %arg1[%c0_104, %c0_105, %c0_106] : memref<1x18x72xbf16, #tpu.memory_space<vmem>>, vector<1x16x72xbf16>
    %97 = vector.shape_cast %96 : vector<1x16x72xbf16> to vector<16x72xbf16>
    %c3 = arith.constant 3 : index
    %c0_107 = arith.constant 0 : index
    %c0_108 = arith.constant 0 : index
    %c0_109 = arith.constant 0 : index
    %98 = vector.load %arg2[%c3, %c0_107, %c0_108, %c0_109] : memref<4x3x72x64xbf16, #tpu.memory_space<vmem>>, vector<1x1x72x64xbf16>
    %99 = vector.shape_cast %98 : vector<1x1x72x64xbf16> to vector<72x64xbf16>
    %cst_110 = arith.constant dense<0.000000e+00> : vector<16x64xf32>
    %100 = tpu.matmul %97, %99, %cst_110 {dimension_numbers = #tpu.dot_dimension_numbers<[1], [0], [0], [1], [0, 0, 1, 1], [], []>} : vector<16x72xbf16>, vector<72x64xbf16>, vector<16x64xf32> -> vector<16x64xf32>
    %c0_111 = arith.constant 0 : index
    %c1_112 = arith.constant 1 : index
    %c0_113 = arith.constant 0 : index
    %101 = vector.load %arg1[%c0_111, %c1_112, %c0_113] : memref<1x18x72xbf16, #tpu.memory_space<vmem>>, vector<1x16x72xbf16>
    %102 = vector.shape_cast %101 : vector<1x16x72xbf16> to vector<16x72xbf16>
    %c3_114 = arith.constant 3 : index
    %c1_115 = arith.constant 1 : index
    %c0_116 = arith.constant 0 : index
    %c0_117 = arith.constant 0 : index
    %103 = vector.load %arg2[%c3_114, %c1_115, %c0_116, %c0_117] : memref<4x3x72x64xbf16, #tpu.memory_space<vmem>>, vector<1x1x72x64xbf16>
    %104 = vector.shape_cast %103 : vector<1x1x72x64xbf16> to vector<72x64xbf16>
    %cst_118 = arith.constant dense<0.000000e+00> : vector<16x64xf32>
    %105 = tpu.matmul %102, %104, %cst_118 {dimension_numbers = #tpu.dot_dimension_numbers<[1], [0], [0], [1], [0, 0, 1, 1], [], []>} : vector<16x72xbf16>, vector<72x64xbf16>, vector<16x64xf32> -> vector<16x64xf32>
    %106 = arith.addf %100, %105 : vector<16x64xf32>
    %c0_119 = arith.constant 0 : index
    %c2_120 = arith.constant 2 : index
    %c0_121 = arith.constant 0 : index
    %107 = vector.load %arg1[%c0_119, %c2_120, %c0_121] : memref<1x18x72xbf16, #tpu.memory_space<vmem>>, vector<1x16x72xbf16>
    %108 = vector.shape_cast %107 : vector<1x16x72xbf16> to vector<16x72xbf16>
    %c3_122 = arith.constant 3 : index
    %c2_123 = arith.constant 2 : index
    %c0_124 = arith.constant 0 : index
    %c0_125 = arith.constant 0 : index
    %109 = vector.load %arg2[%c3_122, %c2_123, %c0_124, %c0_125] : memref<4x3x72x64xbf16, #tpu.memory_space<vmem>>, vector<1x1x72x64xbf16>
    %110 = vector.shape_cast %109 : vector<1x1x72x64xbf16> to vector<72x64xbf16>
    %cst_126 = arith.constant dense<0.000000e+00> : vector<16x64xf32>
    %111 = tpu.matmul %108, %110, %cst_126 {dimension_numbers = #tpu.dot_dimension_numbers<[1], [0], [0], [1], [0, 0, 1, 1], [], []>} : vector<16x72xbf16>, vector<72x64xbf16>, vector<16x64xf32> -> vector<16x64xf32>
    %112 = arith.addf %106, %111 : vector<16x64xf32>
    %113 = arith.truncf %112 : vector<16x64xf32> to vector<16x64xbf16>
    %c0_127 = arith.constant 0 : index
    %c3_128 = arith.constant 3 : index
    %c0_129 = arith.constant 0 : index
    %c0_130 = arith.constant 0 : index
    %114 = vector.load %arg3[%c0_127, %c3_128, %c0_129, %c0_130] : memref<1x4x16x64xbf16, #tpu.memory_space<vmem>>, vector<1x1x16x64xbf16>
    %115 = vector.shape_cast %114 : vector<1x1x16x64xbf16> to vector<16x64xbf16>
    %116 = vector.shape_cast %113 : vector<16x64xbf16> to vector<1x1x16x64xbf16>
    tpu.vector_store %arg3[%c0_127, %c3_128, %c0_129, %c0_130], %116 {strides = array<i32>} : memref<1x4x16x64xbf16, #tpu.memory_space<vmem>>, vector<1x1x16x64xbf16>,
    %cst_131 = arith.constant dense<0.000000e+00> : vector<64xf32>
    %117 = vector.multi_reduction <add>, %112, %cst_131 [0] : vector<16x64xf32> to vector<64xf32>
    %118 = vector.shape_cast %117 : vector<64xf32> to vector<1x64xf32>
    %c0_132 = arith.constant 0 : index
    %c3_133 = arith.constant 3 : index
    %c0_134 = arith.constant 0 : index
    %119 = vector.load %arg4[%c0_132, %c3_133, %c0_134] : memref<1x4x64xf32, #tpu.memory_space<vmem>>, vector<1x1x64xf32>
    %120 = vector.shape_cast %119 : vector<1x1x64xf32> to vector<1x64xf32>
    %121 = vector.shape_cast %118 : vector<1x64xf32> to vector<1x1x64xf32>
    tpu.vector_store %arg4[%c0_132, %c3_133, %c0_134], %121 {strides = array<i32>} : memref<1x4x64xf32, #tpu.memory_space<vmem>>, vector<1x1x64xf32>,
    %122 = arith.mulf %112, %112 : vector<16x64xf32>
    %cst_135 = arith.constant dense<0.000000e+00> : vector<64xf32>
    %123 = vector.multi_reduction <add>, %122, %cst_135 [0] : vector<16x64xf32> to vector<64xf32>
    %124 = vector.shape_cast %123 : vector<64xf32> to vector<1x64xf32>
    %c0_136 = arith.constant 0 : index
    %c3_137 = arith.constant 3 : index
    %c0_138 = arith.constant 0 : index
    %125 = vector.load %arg5[%c0_136, %c3_137, %c0_138] : memref<1x4x64xf32, #tpu.memory_space<vmem>>, vector<1x1x64xf32>
    %126 = vector.shape_cast %125 : vector<1x1x64xf32> to vector<1x64xf32>
    %127 = vector.shape_cast %124 : vector<1x64xf32> to vector<1x1x64xf32>
    tpu.vector_store %arg5[%c0_136, %c3_137, %c0_138], %127 {strides = array<i32>} : memref<1x4x64xf32, #tpu.memory_space<vmem>>, vector<1x1x64xf32>,
    return
  }
  func.func @transform_0(%arg0: i32) -> (i32, i32, i32) {
    %c0_i32 = arith.constant 0 : i32
    %c0_i32_0 = arith.constant 0 : i32
    %c0_i32_1 = arith.constant 0 : i32
    return %arg0, %c0_i32, %c0_i32_0 : i32, i32, i32
  }
  func.func @transform_1(%arg0: i32) -> (i32, i32, i32, i32) {
    %c0_i32 = arith.constant 0 : i32
    %c0_i32_0 = arith.constant 0 : i32
    %c0_i32_1 = arith.constant 0 : i32
    %c0_i32_2 = arith.constant 0 : i32
    %c0_i32_3 = arith.constant 0 : i32
    return %c0_i32, %c0_i32_0, %c0_i32_1, %c0_i32_2 : i32, i32, i32, i32
  }
  func.func @transform_2(%arg0: i32) -> (i32, i32, i32, i32) {
    %c0_i32 = arith.constant 0 : i32
    %c0_i32_0 = arith.constant 0 : i32
    %c0_i32_1 = arith.constant 0 : i32
    %c0_i32_2 = arith.constant 0 : i32
    return %arg0, %c0_i32, %c0_i32_0, %c0_i32_1 : i32, i32, i32, i32
  }
  func.func @transform_3(%arg0: i32) -> (i32, i32, i32) {
    %c0_i32 = arith.constant 0 : i32
    %c0_i32_0 = arith.constant 0 : i32
    %c0_i32_1 = arith.constant 0 : i32
    return %arg0, %c0_i32, %c0_i32_0 : i32, i32, i32
  }
  func.func @transform_4(%arg0: i32) -> (i32, i32, i32) {
    %c0_i32 = arith.constant 0 : i32
    %c0_i32_0 = arith.constant 0 : i32
    %c0_i32_1 = arith.constant 0 : i32
    return %arg0, %c0_i32, %c0_i32_0 : i32, i32, i32
  }
}

module attributes {stable_mosaic.version = 11 : i64} {
  func.func @_affine_prelu_kernel(%arg0: i32, %arg1: memref<4xf32, #tpu.memory_space<smem>>, %arg2: memref<4xf32, #tpu.memory_space<smem>>, %arg3: memref<1xf32, #tpu.memory_space<smem>>, %arg4: memref<1x4x16x64xbf16, #tpu.memory_space<vmem>>, %arg5: memref<1x4x16x64xf32, #tpu.memory_space<vmem>>) attributes {dimension_semantics = [#tpu.dimension_semantics<parallel>], iteration_bounds = array<i64: 2>, scalar_prefetch = 0 : i64, scratch_operands = 0 : i64, tpu.core_type = #tpu.core_type<tc>, window_params = [{transform_indices = @transform_0, window_bounds = array<i64: 4>}, {transform_indices = @transform_1, window_bounds = array<i64: 4>}, {transform_indices = @transform_2, window_bounds = array<i64: 1>}, {transform_indices = @transform_3, window_bounds = array<i64: 1, 4, 16, 64>}, {transform_indices = @transform_4, window_bounds = array<i64: 1, 4, 16, 64>}]} {
    %c0 = arith.constant 0 : index
    %0 = memref.load %arg3[%c0] : memref<1xf32, #tpu.memory_space<smem>>
    %c0_0 = arith.constant 0 : index
    %c0_1 = arith.constant 0 : index
    %c0_2 = arith.constant 0 : index
    %c0_3 = arith.constant 0 : index
    %1 = vector.load %arg4[%c0_0, %c0_1, %c0_2, %c0_3] : memref<1x4x16x64xbf16, #tpu.memory_space<vmem>>, vector<1x1x16x64xbf16>
    %2 = vector.shape_cast %1 : vector<1x1x16x64xbf16> to vector<16x64xbf16>
    %3 = arith.extf %2 : vector<16x64xbf16> to vector<16x64xf32>
    %c0_4 = arith.constant 0 : index
    %4 = memref.load %arg1[%c0_4] : memref<4xf32, #tpu.memory_space<smem>>
    %5 = vector.broadcast %4 : f32 to vector<16x64xf32>
    %6 = arith.mulf %3, %5 : vector<16x64xf32>
    %c0_5 = arith.constant 0 : index
    %7 = memref.load %arg2[%c0_5] : memref<4xf32, #tpu.memory_space<smem>>
    %8 = vector.broadcast %7 : f32 to vector<16x64xf32>
    %9 = arith.addf %6, %8 : vector<16x64xf32>
    %cst = arith.constant 0.000000e+00 : f32
    %10 = vector.broadcast %cst : f32 to vector<16x64xf32>
    %11 = arith.cmpf oge, %9, %10 : vector<16x64xf32>
    %12 = vector.broadcast %0 : f32 to vector<16x64xf32>
    %13 = arith.mulf %12, %9 : vector<16x64xf32>
    %14 = arith.select %11, %9, %13 : vector<16x64xi1>, vector<16x64xf32>
    %c0_6 = arith.constant 0 : index
    %c0_7 = arith.constant 0 : index
    %c0_8 = arith.constant 0 : index
    %c0_9 = arith.constant 0 : index
    %15 = vector.load %arg5[%c0_6, %c0_7, %c0_8, %c0_9] : memref<1x4x16x64xf32, #tpu.memory_space<vmem>>, vector<1x1x16x64xf32>
    %16 = vector.shape_cast %15 : vector<1x1x16x64xf32> to vector<16x64xf32>
    %17 = vector.shape_cast %14 : vector<16x64xf32> to vector<1x1x16x64xf32>
    tpu.vector_store %arg5[%c0_6, %c0_7, %c0_8, %c0_9], %17 {strides = array<i32>} : memref<1x4x16x64xf32, #tpu.memory_space<vmem>>, vector<1x1x16x64xf32>,
    %c0_10 = arith.constant 0 : index
    %c1 = arith.constant 1 : index
    %c0_11 = arith.constant 0 : index
    %c0_12 = arith.constant 0 : index
    %18 = vector.load %arg4[%c0_10, %c1, %c0_11, %c0_12] : memref<1x4x16x64xbf16, #tpu.memory_space<vmem>>, vector<1x1x16x64xbf16>
    %19 = vector.shape_cast %18 : vector<1x1x16x64xbf16> to vector<16x64xbf16>
    %20 = arith.extf %19 : vector<16x64xbf16> to vector<16x64xf32>
    %c1_13 = arith.constant 1 : index
    %21 = memref.load %arg1[%c1_13] : memref<4xf32, #tpu.memory_space<smem>>
    %22 = vector.broadcast %21 : f32 to vector<16x64xf32>
    %23 = arith.mulf %20, %22 : vector<16x64xf32>
    %c1_14 = arith.constant 1 : index
    %24 = memref.load %arg2[%c1_14] : memref<4xf32, #tpu.memory_space<smem>>
    %25 = vector.broadcast %24 : f32 to vector<16x64xf32>
    %26 = arith.addf %23, %25 : vector<16x64xf32>
    %cst_15 = arith.constant 0.000000e+00 : f32
    %27 = vector.broadcast %cst_15 : f32 to vector<16x64xf32>
    %28 = arith.cmpf oge, %26, %27 : vector<16x64xf32>
    %29 = vector.broadcast %0 : f32 to vector<16x64xf32>
    %30 = arith.mulf %29, %26 : vector<16x64xf32>
    %31 = arith.select %28, %26, %30 : vector<16x64xi1>, vector<16x64xf32>
    %c0_16 = arith.constant 0 : index
    %c1_17 = arith.constant 1 : index
    %c0_18 = arith.constant 0 : index
    %c0_19 = arith.constant 0 : index
    %32 = vector.load %arg5[%c0_16, %c1_17, %c0_18, %c0_19] : memref<1x4x16x64xf32, #tpu.memory_space<vmem>>, vector<1x1x16x64xf32>
    %33 = vector.shape_cast %32 : vector<1x1x16x64xf32> to vector<16x64xf32>
    %34 = vector.shape_cast %31 : vector<16x64xf32> to vector<1x1x16x64xf32>
    tpu.vector_store %arg5[%c0_16, %c1_17, %c0_18, %c0_19], %34 {strides = array<i32>} : memref<1x4x16x64xf32, #tpu.memory_space<vmem>>, vector<1x1x16x64xf32>,
    %c0_20 = arith.constant 0 : index
    %c2 = arith.constant 2 : index
    %c0_21 = arith.constant 0 : index
    %c0_22 = arith.constant 0 : index
    %35 = vector.load %arg4[%c0_20, %c2, %c0_21, %c0_22] : memref<1x4x16x64xbf16, #tpu.memory_space<vmem>>, vector<1x1x16x64xbf16>
    %36 = vector.shape_cast %35 : vector<1x1x16x64xbf16> to vector<16x64xbf16>
    %37 = arith.extf %36 : vector<16x64xbf16> to vector<16x64xf32>
    %c2_23 = arith.constant 2 : index
    %38 = memref.load %arg1[%c2_23] : memref<4xf32, #tpu.memory_space<smem>>
    %39 = vector.broadcast %38 : f32 to vector<16x64xf32>
    %40 = arith.mulf %37, %39 : vector<16x64xf32>
    %c2_24 = arith.constant 2 : index
    %41 = memref.load %arg2[%c2_24] : memref<4xf32, #tpu.memory_space<smem>>
    %42 = vector.broadcast %41 : f32 to vector<16x64xf32>
    %43 = arith.addf %40, %42 : vector<16x64xf32>
    %cst_25 = arith.constant 0.000000e+00 : f32
    %44 = vector.broadcast %cst_25 : f32 to vector<16x64xf32>
    %45 = arith.cmpf oge, %43, %44 : vector<16x64xf32>
    %46 = vector.broadcast %0 : f32 to vector<16x64xf32>
    %47 = arith.mulf %46, %43 : vector<16x64xf32>
    %48 = arith.select %45, %43, %47 : vector<16x64xi1>, vector<16x64xf32>
    %c0_26 = arith.constant 0 : index
    %c2_27 = arith.constant 2 : index
    %c0_28 = arith.constant 0 : index
    %c0_29 = arith.constant 0 : index
    %49 = vector.load %arg5[%c0_26, %c2_27, %c0_28, %c0_29] : memref<1x4x16x64xf32, #tpu.memory_space<vmem>>, vector<1x1x16x64xf32>
    %50 = vector.shape_cast %49 : vector<1x1x16x64xf32> to vector<16x64xf32>
    %51 = vector.shape_cast %48 : vector<16x64xf32> to vector<1x1x16x64xf32>
    tpu.vector_store %arg5[%c0_26, %c2_27, %c0_28, %c0_29], %51 {strides = array<i32>} : memref<1x4x16x64xf32, #tpu.memory_space<vmem>>, vector<1x1x16x64xf32>,
    %c0_30 = arith.constant 0 : index
    %c3 = arith.constant 3 : index
    %c0_31 = arith.constant 0 : index
    %c0_32 = arith.constant 0 : index
    %52 = vector.load %arg4[%c0_30, %c3, %c0_31, %c0_32] : memref<1x4x16x64xbf16, #tpu.memory_space<vmem>>, vector<1x1x16x64xbf16>
    %53 = vector.shape_cast %52 : vector<1x1x16x64xbf16> to vector<16x64xbf16>
    %54 = arith.extf %53 : vector<16x64xbf16> to vector<16x64xf32>
    %c3_33 = arith.constant 3 : index
    %55 = memref.load %arg1[%c3_33] : memref<4xf32, #tpu.memory_space<smem>>
    %56 = vector.broadcast %55 : f32 to vector<16x64xf32>
    %57 = arith.mulf %54, %56 : vector<16x64xf32>
    %c3_34 = arith.constant 3 : index
    %58 = memref.load %arg2[%c3_34] : memref<4xf32, #tpu.memory_space<smem>>
    %59 = vector.broadcast %58 : f32 to vector<16x64xf32>
    %60 = arith.addf %57, %59 : vector<16x64xf32>
    %cst_35 = arith.constant 0.000000e+00 : f32
    %61 = vector.broadcast %cst_35 : f32 to vector<16x64xf32>
    %62 = arith.cmpf oge, %60, %61 : vector<16x64xf32>
    %63 = vector.broadcast %0 : f32 to vector<16x64xf32>
    %64 = arith.mulf %63, %60 : vector<16x64xf32>
    %65 = arith.select %62, %60, %64 : vector<16x64xi1>, vector<16x64xf32>
    %c0_36 = arith.constant 0 : index
    %c3_37 = arith.constant 3 : index
    %c0_38 = arith.constant 0 : index
    %c0_39 = arith.constant 0 : index
    %66 = vector.load %arg5[%c0_36, %c3_37, %c0_38, %c0_39] : memref<1x4x16x64xf32, #tpu.memory_space<vmem>>, vector<1x1x16x64xf32>
    %67 = vector.shape_cast %66 : vector<1x1x16x64xf32> to vector<16x64xf32>
    %68 = vector.shape_cast %65 : vector<16x64xf32> to vector<1x1x16x64xf32>
    tpu.vector_store %arg5[%c0_36, %c3_37, %c0_38, %c0_39], %68 {strides = array<i32>} : memref<1x4x16x64xf32, #tpu.memory_space<vmem>>, vector<1x1x16x64xf32>,
    return
  }
  func.func @transform_0(%arg0: i32) -> i32 {
    %c0_i32 = arith.constant 0 : i32
    %c0_i32_0 = arith.constant 0 : i32
    return %c0_i32 : i32
  }
  func.func @transform_1(%arg0: i32) -> i32 {
    %c0_i32 = arith.constant 0 : i32
    %c0_i32_0 = arith.constant 0 : i32
    return %c0_i32 : i32
  }
  func.func @transform_2(%arg0: i32) -> i32 {
    %c0_i32 = arith.constant 0 : i32
    %c0_i32_0 = arith.constant 0 : i32
    return %c0_i32 : i32
  }
  func.func @transform_3(%arg0: i32) -> (i32, i32, i32, i32) {
    %c0_i32 = arith.constant 0 : i32
    %c0_i32_0 = arith.constant 0 : i32
    %c0_i32_1 = arith.constant 0 : i32
    %c0_i32_2 = arith.constant 0 : i32
    return %arg0, %c0_i32, %c0_i32_0, %c0_i32_1 : i32, i32, i32, i32
  }
  func.func @transform_4(%arg0: i32) -> (i32, i32, i32, i32) {
    %c0_i32 = arith.constant 0 : i32
    %c0_i32_0 = arith.constant 0 : i32
    %c0_i32_1 = arith.constant 0 : i32
    %c0_i32_2 = arith.constant 0 : i32
    return %arg0, %c0_i32, %c0_i32_0, %c0_i32_1 : i32, i32, i32, i32
  }
}

</mosaic_0001>

<bundles_post_ra>
// kernel: subpixel_block_forward.2
= control target key start
LH: loop header
LB: loop body
LE: loop exit
PB: predicated region body
PF: predicated region fallthrough
CT: control target
= control target key end

     0   :  { %s1698_s15 = smov 0   ;;  %s2029_s0 = inlined_call_operand.vmem [shape: bf16[2,18,72], index: 0, kind: input, shape index: {}]   ;;  %s2030_s1 = inlined_call_operand.vmem [shape: bf16[4,3,72,64], index: 1, kind: input, shape index: {}]   ;;  %s2031_s2 = inlined_call_operand.vmem [shape: bf16[2,4,16,64], index: 2, kind: output, shape index: {0}]   ;;  %s2032_s3 = inlined_call_operand.vmem [shape: f32[2,4,64], index: 3, kind: output, shape index: {1}]   ;;  %s2033_s4 = inlined_call_operand.vmem [shape: f32[2,4,64], index: 4, kind: output, shape index: {2}]  }
   0x1 LB: > { %s1258_s16 = sadd.s32 4294967295, %s1671_s15   ;;  %p1262_p0 = scmp.ge.s32.totalorder %s1671_s15, 1  ;;  %s1671_s15 = sphi %s1698_s15, %s15_s15  }
   0x2   : > { %p167_p1 = scmp.lt.s32.totalorder %s1671_s15, 3 }
   0x4   : > { %p168_p2 = pnand %p1262_p0, %p167_p1 }
   0x5   : > { %p201_p3 = scmp.lt.s32.totalorder (!%p168_p2), %s1258_s16, 1 }
   0x6   : > { %171 = sbr.rel (%p168_p2) target bundleno = 239 (0xef), region = 28 }
   0xb   : > { %v1276_v0 = vld [vmem:[%s2030_s1 + $0x44] sm:$0xf]  ;;  %v230_v1 = vld [vmem:[%s2030_s1 + $0x20] sm:$0xf]  ;;  %v1319_v4 = vld [vmem:[%s2030_s1 + $0x68] sm:$0xf] }
   0xc   : > { %v280_v2 = vunpack.c.l.b16 %v1276_v0  ;;  %v329_v3 = vunpack.c.l.b16 %v230_v1  ;;  %v1354_v5 = vld [vmem:[%s2030_s1 + $0xb0] sm:$0xf]  ;;  %vm294_vm0 = vcmask 1043456   ;;  %v393_v6 = vunpack.c.l.b16 %v1319_v4  ;;  %s2035_s16 = smov (!%p201_p3, %s1258_s16), 1  ;;  %v1587_v16 = vld [vmem:[%s2030_s1 + $0x3c] sm:$0xff]  ;;  %v1599_v19 = vld [vmem:[%s2030_s1 + $0xa8] sm:$0xff] }
   0xd   : > { %v514_v7 = vunpack.c.l.b16 %v1354_v5  ;;  %s1656_s25 = smul.u32 12, %s2035_s16  ;;  %v1583_v17 = vld [vmem:[%s2030_s1 + $0x18] sm:$0xff]  ;;  %v1591_v18 = vld [vmem:[%s2030_s1 + $0x60] sm:$0xff]  ;;  %v1582_v23 = vld [vmem:[%s2030_s1 + $0x10] sm:$0xff]  ;;  %vm250_vm1 = vsmask.f32 7424 }
   0xe   : > { %v285_v8 = vpack.c.b16 %v280_v2, %v280_v2  ;;  %v334_v9 = vpack.c.b16 %v329_v3, %v329_v3  ;;  %v398_v10 = vpack.c.b16 %v393_v6, %v393_v6  ;;  %v1586_v22 = vld [vmem:[%s2030_s1 + $0x34] sm:$0xff]  ;;  %v1345_v27 = vld [vmem:[%s2030_s1 + $0x8c] sm:$0xf]  ;;  %v1598_v30 = vld [vmem:[%s2030_s1 + $0xa0] sm:$0xff]  ;;  %vm372_vm2 = vcmask 1046528   ;;  %s1579_s24 = sshll.u32 %s2035_s16, 5 }
   0xf   : > { %v519_v11 = vpack.c.b16 %v514_v7, %v514_v7  ;;  %s1740_s10 = scalar_lea.vmem %s2029_s0, %s1656_s25  ;;  %v1590_v26 = vld [vmem:[%s2030_s1 + $0x58] sm:$0xff]  ;;  %v1397_v28 = vld [vmem:[%s2030_s1 + $0xd4] sm:$0xf]  ;;  %v561_v36 = vunpack.c.l.b16 %v1345_v27  ;;  %v1585_v40 = vld [vmem:[%s2030_s1 + $0x2c] sm:$0xff]  ;;  %vm290_vm3 = vcmask 588800   ;;  %s1965_s27 = scalar_lea.vmem %s2031_s2, %s1579_s24  ;;  %vm427_vm4 = vcmask 519168  }
  0x10   : > { %v296_v12 = vsel %vm294_vm0, %v285_v8, 0  ;;  %v342_v13 = vsel %vm294_vm0, %v334_v9, 0  ;;  %v407_v14 = vsel %vm294_vm0, %v398_v10, 0  ;;  %v1743_v20 = vld [vmem:[%s1740_s10] sm:$0xff]   ;;  %v231_v21 = vld [vmem:[%s1740_s10 + $0x8] sm:$0x1]  ;;  %v624_v37 = vunpack.c.l.b16 %v1397_v28 }
  0x11   : > { %301 = vmatpush.bf16.msra.mxu0 %v296_v12  ;;  %347 = vmatpush.bf16.msra.mxu1 %v342_v13  ;;  %v528_v15 = vsel %vm294_vm0, %v519_v11, 0  ;;  %v247_v24 = vunpack.c.l.b16 %v231_v21  ;;  %v466_v25 = vld [vmem:[%s1740_s10 + $0x8] sm:$0x1]  ;;  %v1434_v31 = vld [vmem:[%s2030_s1 + $0x11c] sm:$0xf]  ;;  %v254_v34 = vshll.u32 %v1743_v20, 16  ;;  %v566_v51 = vpack.c.b16 %v561_v36, %v561_v36 }
  0x12   : > { %412 = vmatpush.bf16.msra.mxu2 %v407_v14  ;;  %533 = vmatpush.bf16.msra.mxu3 %v528_v15  ;;  %v482_v29 = vunpack.c.l.b16 %v466_v25  ;;  %v1425_v32 = vld [vmem:[%s2030_s1 + $0xf8] sm:$0xf]  ;;  %v1644_v38 = vld [vmem:[%s1740_s10] sm:$0xf0]  ;;  %v1645_v39 = vld [vmem:[%s1740_s10] sm:$0xe]  ;;  %v743_v42 = vunpack.c.l.b16 %v1434_v31  ;;  %v629_v52 = vpack.c.b16 %v624_v37, %v624_v37 }
  0x13   : > { %v249_v33 = vpack.c.b16 %v247_v24, %v247_v24  ;;  %v1581_v41 = vld [vmem:[%s2030_s1 + $0x8] sm:$0xff]  ;;  %v790_v43 = vunpack.c.l.b16 %v1425_v32  ;;  %v1589_v44 = vld [vmem:[%s2030_s1 + $0x50] sm:$0xff]  ;;  %v1597_v45 = vld [vmem:[%s2030_s1 + $0x98] sm:$0xff]  ;;  %v252_v46 = vshrl.u32 %v1743_v20, 16  ;;  %v256_v47 = vrot.slane %v254_v34, 1  ;;  %s1266_s28 = sshll.u32 %s2035_s16, 2 }
  0x14   : > { %v1772_v35 = vpack.c.b16 %v482_v29, %v482_v29  ;;  %v1646_v49 = vor.u32 %v1645_v39, %v1644_v38  ;;  %v1584_v53 = vld [vmem:[%s2030_s1 + $0x24] sm:$0xff]  ;;  %v748_v55 = vpack.c.b16 %v743_v42, %v743_v42  ;;  %v1596_v58 = vld [vmem:[%s2030_s1 + $0x90] sm:$0xff]  ;;  %v574_v0 = vsel %vm294_vm0, %v566_v51, 0  ;;  %v1594_v13 = vld [vmem:[%s2030_s1 + $0x7c] sm:$0xff]  ;;  %s1981_s5 = scalar_lea.vmem %s2032_s3, %s1266_s28  ;;  %s1988_s7 = scalar_lea.vmem %s2033_s4, %s1266_s28 }
  0x15   : > { %302 = vmatpush.bf16.msra.mxu0 %v1587_v16  ;;  %348 = vmatpush.bf16.msra.mxu1 %v1583_v17  ;;  %v259_v48 = vshll.u32 %v249_v33, 16  ;;  %v1580_v54 = vld [vmem:[%s2030_s1] sm:$0xff]  ;;  %v795_v56 = vpack.c.b16 %v790_v43, %v790_v43  ;;  %v1588_v57 = vld [vmem:[%s2030_s1 + $0x48] sm:$0xff]  ;;  %v1802_v59 = vor.u32 %v256_v47, %v252_v46  ;;  %v374_v62 = vrot.slane %v249_v33, 1  ;;  %v1611_v10 = vld [vmem:[%s2030_s1 + $0x114] sm:$0xff] }
  0x16   : > { %413 = vmatpush.bf16.msra.mxu2 %v1591_v18  ;;  %534 = vmatpush.bf16.msra.mxu3 %v1599_v19  ;;  %v493_v50 = vshll.u32 %v1772_v35, 16  ;;  %v373_v61 = vrot.slane %v1646_v49, 1  ;;  %v638_v1 = vsel %vm294_vm0, %v629_v52, 0  ;;  %v757_v2 = vsel %vm294_vm0, %v748_v55, 0  ;;  %v695_v5 = vld [vmem:[%s1740_s10 + $0x8] sm:$0x1] }
  0x17   : > { %v261_v60 = vrot.slane %v259_v48, 1  ;;  %v803_v3 = vsel %vm294_vm0, %v795_v56, 0  ;;  %v1595_v8 = vld [vmem:[%s2030_s1 + $0x84] sm:$0xff]  ;;  %v1603_v9 = vld [vmem:[%s2030_s1 + $0xcc] sm:$0xff]  ;;  %v711_v12 = vunpack.c.l.b16 %v695_v5  ;;  %v1477_v16 = vld [vmem:[%s2030_s1 + $0x140] sm:$0xf] }
  0x18   : > { %v495_v63 = vrot.slane %v493_v50, 1  ;;  %v375_v6 = vsel %vm372_vm2, %v373_v61, %v374_v62  ;;  %v1607_v11 = vld [vmem:[%s2030_s1 + $0xf0] sm:$0xff]  ;;  %v1602_v14 = vld [vmem:[%s2030_s1 + $0xc4] sm:$0xff]  ;;  %v1557_v21 = vld [vmem:[%s2030_s1 + $0x1ac] sm:$0xf]  ;;  %v853_v25 = vunpack.c.l.b16 %v1477_v16  ;;  %vm430_vm5 = vcmask 523264  }
  0x19   : > { %303 = vmatpush.bf16.msra.mxu0 %v1586_v22  ;;  %349 = vmatpush.bf16.msra.mxu1 %v1582_v23  ;;  %v262_v4 = vsel %vm250_vm1, %v1802_v59, %v261_v60  ;;  %v1610_v15 = vld [vmem:[%s2030_s1 + $0x10c] sm:$0xff]  ;;  %v1514_v17 = vld [vmem:[%s2030_s1 + $0x188] sm:$0xf]  ;;  %v1505_v19 = vld [vmem:[%s2030_s1 + $0x164] sm:$0xf]  ;;  %v1857_v24 = vpack.c.b16 %v711_v12, %v711_v12  ;;  %vm440_vm6 = vcmask 516096  }
  0x1a   : > { %414 = vmatpush.bf16.msra.mxu2 %v1590_v26  ;;  %535 = vmatpush.bf16.msra.mxu3 %v1598_v30  ;;  %v496_v7 = vsel %vm250_vm1, %v1802_v59, %v495_v63  ;;  %v1606_v18 = vld [vmem:[%s2030_s1 + $0xe8] sm:$0xff]  ;;  %v1647_v22 = vld [vmem:[%s1740_s10] sm:$0xf0]  ;;  %v1648_v23 = vld [vmem:[%s1740_s10] sm:$0xe]  ;;  %v972_v26 = vunpack.c.l.b16 %v1514_v17  ;;  %v1019_v29 = vunpack.c.l.b16 %v1505_v19  ;;  %v1082_v30 = vunpack.c.l.b16 %v1557_v21 }
  0x1b   : > { %v1593_v27 = vld [vmem:[%s2030_s1 + $0x74] sm:$0xff]  ;;  %v1601_v28 = vld [vmem:[%s2030_s1 + $0xbc] sm:$0xff]  ;;  %v1609_v31 = vld [vmem:[%s2030_s1 + $0x104] sm:$0xff]  ;;  %v1649_v33 = vor.u32 %v1648_v23, %v1647_v22  ;;  %v722_v34 = vshll.u32 %v1857_v24, 16  ;;  %v858_v36 = vpack.c.b16 %v853_v25, %v853_v25 }
  0x1c   : > { %v1605_v32 = vld [vmem:[%s2030_s1 + $0xe0] sm:$0xff]  ;;  %v977_v37 = vpack.c.b16 %v972_v26, %v972_v26  ;;  %v1592_v38 = vld [vmem:[%s2030_s1 + $0x6c] sm:$0xff]  ;;  %v1600_v39 = vld [vmem:[%s2030_s1 + $0xb4] sm:$0xff] }
  0x1d   : > { %304 = vmatpush.bf16.msra.mxu0 %v1585_v40  ;;  %350 = vmatpush.bf16.msra.mxu1 %v1581_v41  ;;  %v1024_v40 = vpack.c.b16 %v1019_v29, %v1019_v29  ;;  %v1087_v41 = vpack.c.b16 %v1082_v30, %v1082_v30  ;;  %v1608_v42 = vld [vmem:[%s2030_s1 + $0xfc] sm:$0xff]  ;;  %v724_v46 = vrot.slane %v722_v34, 1  ;;  %v867_v47 = vsel %vm294_vm0, %v858_v36, 0  ;;  %v924_v49 = vld [vmem:[%s1740_s10 + $0x8] sm:$0x1]  ;;  %v1618_v61 = vld [vmem:[%s2030_s1 + $0x154] sm:$0xff] }
  0x1e   : > { %415 = vmatpush.bf16.msra.mxu2 %v1589_v44  ;;  %536 = vmatpush.bf16.msra.mxu3 %v1597_v45  ;;  %v1604_v43 = vld [vmem:[%s2030_s1 + $0xd8] sm:$0xff]  ;;  %v604_v44 = vrot.slane %v1649_v33, 1  ;;  %v605_v45 = vrot.slane %v1772_v35, 1  ;;  %v986_v48 = vsel %vm294_vm0, %v977_v37, 0  ;;  %v940_v55 = vunpack.c.l.b16 %v924_v49  ;;  %v1621_v5 = vld [vmem:[%s2030_s1 + $0x170] sm:$0xff]  ;;  %v1620_v12 = vld [vmem:[%s2030_s1 + $0x168] sm:$0xff] }
  0x1f   : > { %v1032_v50 = vsel %vm294_vm0, %v1024_v40, 0  ;;  %v1096_v51 = vsel %vm294_vm0, %v1087_v41, 0  ;;  %v725_v35 = vsel %vm250_vm1, %v1802_v59, %v724_v46  ;;  %v1619_v56 = vld [vmem:[%s2030_s1 + $0x15c] sm:$0xff]  ;;  %v1616_v16 = vld [vmem:[%s2030_s1 + $0x144] sm:$0xff]  ;;  %v1624_v17 = vld [vmem:[%s2030_s1 + $0x18c] sm:$0xff] }
  0x20   : > { %v606_v52 = vsel %vm372_vm2, %v604_v44, %v605_v45  ;;  %v1622_v60 = vld [vmem:[%s2030_s1 + $0x178] sm:$0xff]  ;;  %v942_v62 = vpack.c.b16 %v940_v55, %v940_v55 }
  0x21   : > { %305 = vmatpush.bf16.msra.mxu0 %v1584_v53  ;;  %351 = vmatpush.bf16.msra.mxu1 %v1580_v54  ;;  %v1615_v53 = vld [vmem:[%s2030_s1 + $0x138] sm:$0xff]  ;;  %v1623_v54 = vld [vmem:[%s2030_s1 + $0x180] sm:$0xff] }
  0x22   : > { %416 = vmatpush.bf16.msra.mxu2 %v1588_v57  ;;  %537 = vmatpush.bf16.msra.mxu3 %v1596_v58  ;;  %v1627_v57 = vld [vmem:[%s2030_s1 + $0x1a4] sm:$0xff]  ;;  %v1614_v58 = vld [vmem:[%s2030_s1 + $0x130] sm:$0xff]  ;;  %v1626_v63 = vld [vmem:[%s2030_s1 + $0x19c] sm:$0xff]  ;;  %v1063_v19 = vrot.slane %v942_v62, 1 }
  0x24   : > { %1293 = vmatmul.msk.bf16.vlgmr.msra.gmra.mxu0 %vm290_vm3, %v262_v4  ;;  %1310 = vmatmul.msk.bf16.vlgmr.msra.gmra.mxu1 %vm290_vm3, %v1743_v20  ;;  %v1613_v4 = vld [vmem:[%s2030_s1 + $0x128] sm:$0xff] }
  0x25   : > { %579 = vmatpush.bf16.msrb.mxu0 %v574_v0  ;;  %643 = vmatpush.bf16.msrb.mxu1 %v638_v1  ;;  %v1650_v0 = vld [vmem:[%s1740_s10] sm:$0xf0]  ;;  %v1651_v1 = vld [vmem:[%s1740_s10] sm:$0xe] }
  0x26   : > { %762 = vmatpush.bf16.msrb.mxu2 %v757_v2  ;;  %808 = vmatpush.bf16.msrb.mxu3 %v803_v3  ;;  %v1653_v2 = vld [vmem:[%s1740_s10] sm:$0xf0]  ;;  %v1654_v3 = vld [vmem:[%s1740_s10] sm:$0xe] }
  0x27   : > { %1336 = vmatmul.msk.bf16.vlgmr.msra.gmra.mxu2 %vm290_vm3, %v375_v6  ;;  %1371 = vmatmul.msk.bf16.vlgmr.msra.gmra.mxu3 %vm290_vm3, %v496_v7  ;;  %v1652_v6 = vor.u32 %v1651_v1, %v1650_v0  ;;  %v951_v7 = vshll.u32 %v942_v62, 16 }
  0x29   : > { %580 = vmatpush.bf16.msrb.mxu0 %v1595_v8  ;;  %644 = vmatpush.bf16.msrb.mxu1 %v1603_v9  ;;  %v1617_v8 = vld [vmem:[%s2030_s1 + $0x14c] sm:$0xff]  ;;  %v1625_v9 = vld [vmem:[%s2030_s1 + $0x194] sm:$0xff] }
  0x2a   : > { %763 = vmatpush.bf16.msrb.mxu2 %v1611_v10  ;;  %809 = vmatpush.bf16.msrb.mxu3 %v1607_v11  ;;  %v1655_v10 = vor.u32 %v1654_v3, %v1653_v2  ;;  %v1612_v11 = vld [vmem:[%s2030_s1 + $0x120] sm:$0xff] }
  0x2d   : > { %581 = vmatpush.bf16.msrb.mxu0 %v1594_v13  ;;  %645 = vmatpush.bf16.msrb.mxu1 %v1602_v14  ;;  %v833_v13 = vrot.slane %v1652_v6, 1  ;;  %v834_v14 = vrot.slane %v1857_v24, 1 }
  0x2e   : > { %764 = vmatpush.bf16.msrb.mxu2 %v1610_v15  ;;  %810 = vmatpush.bf16.msrb.mxu3 %v1606_v18  ;;  %v953_v15 = vrot.slane %v951_v7, 1  ;;  %v1062_v18 = vrot.slane %v1655_v10, 1 }
  0x2f   : > { %v835_v21 = vsel %vm372_vm2, %v833_v13, %v834_v14 }
  0x30   : > { %v954_v22 = vsel %vm250_vm1, %v1802_v59, %v953_v15  ;;  %v1064_v23 = vsel %vm372_vm2, %v1062_v18, %v1063_v19 }
  0x31   : > { %582 = vmatpush.bf16.msrb.mxu0 %v1593_v27  ;;  %646 = vmatpush.bf16.msrb.mxu1 %v1601_v28 }
  0x32   : > { %765 = vmatpush.bf16.msrb.mxu2 %v1609_v31  ;;  %811 = vmatpush.bf16.msrb.mxu3 %v1605_v32 }
  0x35   : > { %583 = vmatpush.bf16.msrb.mxu0 %v1592_v38  ;;  %647 = vmatpush.bf16.msrb.mxu1 %v1600_v39 }
  0x36   : > { %766 = vmatpush.bf16.msrb.mxu2 %v1608_v42  ;;  %812 = vmatpush.bf16.msrb.mxu3 %v1604_v43 }
  0x38   : > { %1388 = vmatmul.msk.bf16.vlgmr.msrb.gmra.mxu0 %vm290_vm3, %v1743_v20  ;;  %1414 = vmatmul.msk.bf16.vlgmr.msrb.gmra.mxu1 %vm290_vm3, %v606_v52 }
  0x39   : > { %872 = vmatpush.bf16.msra.mxu0 %v867_v47  ;;  %991 = vmatpush.bf16.msra.mxu1 %v986_v48 }
  0x3a   : > { %1037 = vmatpush.bf16.msra.mxu2 %v1032_v50  ;;  %1101 = vmatpush.bf16.msra.mxu3 %v1096_v51 }
  0x3b   : > { %1451 = vmatmul.msk.bf16.vlgmr.msrb.gmra.mxu2 %vm290_vm3, %v725_v35  ;;  %1468 = vmatmul.msk.bf16.vlgmr.msrb.gmra.mxu3 %vm290_vm3, %v1743_v20 }
  0x3d   : > { %873 = vmatpush.bf16.msra.mxu0 %v1615_v53  ;;  %992 = vmatpush.bf16.msra.mxu1 %v1623_v54 }
  0x3e   : > { %1038 = vmatpush.bf16.msra.mxu2 %v1619_v56  ;;  %1102 = vmatpush.bf16.msra.mxu3 %v1627_v57 }
  0x41   : > { %874 = vmatpush.bf16.msra.mxu0 %v1614_v58  ;;  %993 = vmatpush.bf16.msra.mxu1 %v1622_v60 }
  0x42   : > { %1039 = vmatpush.bf16.msra.mxu2 %v1618_v61  ;;  %1103 = vmatpush.bf16.msra.mxu3 %v1626_v63 }
  0x45   : > { %875 = vmatpush.bf16.msra.mxu0 %v1613_v4  ;;  %994 = vmatpush.bf16.msra.mxu1 %v1621_v5 }
  0x46   : > { %1040 = vmatpush.bf16.msra.mxu2 %v1617_v8  ;;  %1104 = vmatpush.bf16.msra.mxu3 %v1625_v9 }
  0x49   : > { %876 = vmatpush.bf16.msra.mxu0 %v1612_v11  ;;  %995 = vmatpush.bf16.msra.mxu1 %v1620_v12 }
  0x4a   : > { %1041 = vmatpush.bf16.msra.mxu2 %v1616_v16  ;;  %1105 = vmatpush.bf16.msra.mxu3 %v1624_v17 }
  0x4c   : > { %1494 = vmatmul.msk.bf16.vlgmr.msra.gmra.mxu0 %vm290_vm3, %v835_v21  ;;  %1531 = vmatmul.msk.bf16.vlgmr.msra.gmra.mxu1 %vm290_vm3, %v954_v22 }
  0x4d   : > { %1548 = vmatmul.msk.bf16.vlgmr.msra.gmra.mxu2 %vm290_vm3, %v1743_v20  ;;  %1574 = vmatmul.msk.bf16.vlgmr.msra.gmra.mxu3 %vm290_vm3, %v1064_v23 }
  0xa1   : > { %v307_v24 = vpop.f32.mrf.mxu0  ;;  %v353_v25 = vpop.f32.mrf.mxu1 }
  0xa2   : > { %v354_v26 = vadd.f32 %v353_v25, %v307_v24 }
  0xa9   : > { %v309_v29 = vpop.f32.mrf.mxu0  ;;  %v355_v30 = vpop.f32.mrf.mxu1 }
  0xaa   : > { %v418_v27 = vpop.f32.mrf.mxu2  ;;  %v539_v28 = vpop.f32.mrf.mxu3  ;;  %v356_v20 = vadd.f32 %v355_v30, %v309_v29 }
  0xab   : > { %v423_v59 = vadd.f32 %v418_v27, %v354_v26 }
  0xad   : > { %v425_v31 = vpack.c.bf16 %v423_v59, %v423_v59  ;;  %v442_v34 = vmul.f32 %v423_v59, %v423_v59  ;;  %v431_v37 = vsel %vm430_vm5, %v423_v59, 0.0 }
  0xaf   : > { %428 = vst.msk [vmem:[%s1965_s27] sm:$0xf] %vm427_vm4, %v425_v31  ;;  %v444_v45 = vsel %vm430_vm5, %v442_v34, 0.0 }
  0xb2   : > { %v420_v32 = vpop.f32.mrf.mxu2  ;;  %v541_v33 = vpop.f32.mrf.mxu3 }
  0xb3   : > { %v424_v36 = vadd.f32 %v420_v32, %v356_v20 }
  0xb5   : > { %v426_v38 = vpack.c.bf16 %v424_v36, %v424_v36  ;;  %v432_v39 = vsel %vm430_vm5, %v424_v36, 0.0  ;;  %v443_v40 = vmul.f32 %v424_v36, %v424_v36  ;;  %v585_v41 = vpop.f32.mrf.mxu0  ;;  %v649_v42 = vpop.f32.mrf.mxu1 }
  0xb6   : > { %v433_v43 = vadd.f32 %v432_v39, %v431_v37  ;;  %v586_v44 = vadd.f32 %v585_v41, %v539_v28 }
  0xb7   : > { %429 = vst.msk [vmem:[%s1965_s27 + $0x4] sm:$0xf] %vm427_vm4, %v426_v38  ;;  %v445_v46 = vsel %vm430_vm5, %v443_v40, 0.0 }
  0xb8   : > { %v434_v47 = vrot.slane %v433_v43, 4  ;;  %v446_v48 = vadd.f32 %v445_v46, %v444_v45  ;;  %v654_v49 = vadd.f32 %v649_v42, %v586_v44 }
  0xba   : > { %v435_v50 = vadd.f32 %v434_v47, %v433_v43  ;;  %v447_v51 = vrot.slane %v446_v48, 4  ;;  %v656_v52 = vpack.c.bf16 %v654_v49, %v654_v49  ;;  %v661_v1 = vsel %vm430_vm5, %v654_v49, 0.0 }
  0xbb   : > { %v671_v2 = vmul.f32 %v654_v49, %v654_v49 }
  0xbc   : > { %v436_v35 = vrot.slane %v435_v50, 2  ;;  %v448_v53 = vadd.f32 %v447_v51, %v446_v48  ;;  %1415 = vst.msk [vmem:[%s1965_s27 + $0x8] sm:$0xf] %vm427_vm4, %v656_v52 }
  0xbd   : > { %v587_v56 = vpop.f32.mrf.mxu0  ;;  %v651_v61 = vpop.f32.mrf.mxu1  ;;  %v673_v12 = vsel %vm430_vm5, %v671_v2, 0.0 }
  0xbe   : > { %v768_v54 = vpop.f32.mrf.mxu2  ;;  %v814_v55 = vpop.f32.mrf.mxu3  ;;  %v437_v57 = vadd.f32 %v436_v35, %v435_v50  ;;  %v449_v58 = vrot.slane %v448_v53, 2  ;;  %v588_v60 = vadd.f32 %v587_v56, %v541_v33 }
  0xbf   : > { %v815_v13 = vadd.f32 %v814_v55, %v768_v54 }
  0xc0   : > { %v438_v62 = vrot.slane %v437_v57, 1  ;;  %v450_v63 = vadd.f32 %v449_v58, %v448_v53  ;;  %v655_v0 = vadd.f32 %v651_v61, %v588_v60 }
  0xc2   : > { %v439_v3 = vadd.f32 %v438_v62, %v437_v57  ;;  %v451_v4 = vrot.slane %v450_v63, 1  ;;  %v657_v5 = vpack.c.bf16 %v655_v0, %v655_v0  ;;  %v662_v6 = vsel %vm430_vm5, %v655_v0, 0.0 }
  0xc3   : > { %v663_v7 = vadd.f32 %v662_v6, %v661_v1  ;;  %v672_v8 = vmul.f32 %v655_v0, %v655_v0 }
  0xc4   : > { %441 = vst.msk [vmem:[%s1981_s5] sm:$0x1] %vm440_vm6, %v439_v3  ;;  %v452_v9 = vadd.f32 %v451_v4, %v450_v63 }
  0xc5   : > { %1416 = vst.msk [vmem:[%s1965_s27 + $0xc] sm:$0xf] %vm427_vm4, %v657_v5  ;;  %v664_v14 = vrot.slane %v663_v7, 4  ;;  %v674_v15 = vsel %vm430_vm5, %v672_v8, 0.0 }
  0xc6   : > { %v770_v10 = vpop.f32.mrf.mxu2  ;;  %v816_v11 = vpop.f32.mrf.mxu3  ;;  %453 = vst.msk [vmem:[%s1988_s7] sm:$0x1] %vm440_vm6, %v452_v9  ;;  %v675_v16 = vadd.f32 %v674_v15, %v673_v12 }
  0xc7   : > { %v665_v18 = vadd.f32 %v664_v14, %v663_v7  ;;  %v817_v59 = vadd.f32 %v816_v11, %v770_v10 }
  0xc8   : > { %v676_v21 = vrot.slane %v675_v16, 4 }
  0xc9   : > { %v878_v17 = vpop.f32.mrf.mxu0  ;;  %v666_v22 = vrot.slane %v665_v18, 2  ;;  %v997_v26 = vpop.f32.mrf.mxu1 }
  0xca   : > { %v883_v19 = vadd.f32 %v878_v17, %v815_v13  ;;  %v677_v24 = vadd.f32 %v676_v21, %v675_v16 }
  0xcb   : > { %v667_v25 = vadd.f32 %v666_v22, %v665_v18 }
  0xcc   : > { %v885_v23 = vpack.c.bf16 %v883_v19, %v883_v19  ;;  %v678_v27 = vrot.slane %v677_v24, 2  ;;  %v900_v34 = vmul.f32 %v883_v19, %v883_v19  ;;  %v890_v43 = vsel %vm430_vm5, %v883_v19, 0.0 }
  0xcd   : > { %v668_v28 = vrot.slane %v667_v25, 1 }
  0xce   : > { %1495 = vst.msk [vmem:[%s1965_s27 + $0x10] sm:$0xf] %vm427_vm4, %v885_v23  ;;  %v679_v31 = vadd.f32 %v678_v27, %v677_v24  ;;  %v902_v45 = vsel %vm430_vm5, %v900_v34, 0.0 }
  0xcf   : > { %v669_v33 = vadd.f32 %v668_v28, %v667_v25 }
  0xd0   : > { %v1043_v29 = vpop.f32.mrf.mxu2  ;;  %v1107_v30 = vpop.f32.mrf.mxu3  ;;  %v680_v37 = vrot.slane %v679_v31, 1 }
  0xd1   : > { %v1044_v20 = vadd.f32 %v1043_v29, %v997_v26  ;;  %v880_v32 = vpop.f32.mrf.mxu0  ;;  %670 = vst.msk [vmem:[%s1981_s5 + $0x1] sm:$0x1] %vm440_vm6, %v669_v33  ;;  %v999_v50 = vpop.f32.mrf.mxu1 }
  0xd2   : > { %v884_v36 = vadd.f32 %v880_v32, %v817_v59  ;;  %v681_v42 = vadd.f32 %v680_v37, %v679_v31 }
  0xd3   : > { %v1112_v38 = vadd.f32 %v1107_v30, %v1044_v20 }
  0xd4   : > { %v886_v39 = vpack.c.bf16 %v884_v36, %v884_v36  ;;  %v891_v40 = vsel %vm430_vm5, %v884_v36, 0.0  ;;  %v901_v41 = vmul.f32 %v884_v36, %v884_v36  ;;  %682 = vst.msk [vmem:[%s1988_s7 + $0x1] sm:$0x1] %vm440_vm6, %v681_v42 }
  0xd5   : > { %v1114_v44 = vpack.c.bf16 %v1112_v38, %v1112_v38  ;;  %v892_v46 = vadd.f32 %v891_v40, %v890_v43  ;;  %v1129_v55 = vmul.f32 %v1112_v38, %v1112_v38  ;;  %v1119_v58 = vsel %vm430_vm5, %v1112_v38, 0.0 }
  0xd6   : > { %1496 = vst.msk [vmem:[%s1965_s27 + $0x14] sm:$0xf] %vm427_vm4, %v886_v39  ;;  %v903_v47 = vsel %vm430_vm5, %v901_v41, 0.0 }
  0xd7   : > { %v904_v48 = vadd.f32 %v903_v47, %v902_v45  ;;  %1575 = vst.msk [vmem:[%s1965_s27 + $0x18] sm:$0xf] %vm427_vm4, %v1114_v44  ;;  %v893_v49 = vrot.slane %v892_v46, 4  ;;  %v1131_v3 = vsel %vm430_vm5, %v1129_v55, 0.0 }
  0xd8   : > { %v1045_v51 = vpop.f32.mrf.mxu2  ;;  %v1109_v54 = vpop.f32.mrf.mxu3 }
  0xd9   : > { %v905_v52 = vrot.slane %v904_v48, 4  ;;  %v1046_v35 = vadd.f32 %v1045_v51, %v999_v50  ;;  %v894_v53 = vadd.f32 %v893_v49, %v892_v46 }
  0xdb   : > { %v906_v56 = vadd.f32 %v905_v52, %v904_v48  ;;  %v1113_v57 = vadd.f32 %v1109_v54, %v1046_v35  ;;  %v895_v60 = vrot.slane %v894_v53, 2 }
  0xdd   : > { %v907_v61 = vrot.slane %v906_v56, 2  ;;  %v1115_v62 = vpack.c.bf16 %v1113_v57, %v1113_v57  ;;  %v1120_v63 = vsel %vm430_vm5, %v1113_v57, 0.0  ;;  %v1130_v0 = vmul.f32 %v1113_v57, %v1113_v57 }
  0xde   : > { %v896_v1 = vadd.f32 %v895_v60, %v894_v53  ;;  %v1121_v2 = vadd.f32 %v1120_v63, %v1119_v58 }
  0xdf   : > { %v908_v4 = vadd.f32 %v907_v61, %v906_v56  ;;  %1576 = vst.msk [vmem:[%s1965_s27 + $0x1c] sm:$0xf] %vm427_vm4, %v1115_v62  ;;  %v1132_v5 = vsel %vm430_vm5, %v1130_v0, 0.0 }
  0xe0   : > { %v897_v6 = vrot.slane %v896_v1, 1  ;;  %v1122_v7 = vrot.slane %v1121_v2, 4  ;;  %v1133_v8 = vadd.f32 %v1132_v5, %v1131_v3 }
  0xe1   : > { %v909_v9 = vrot.slane %v908_v4, 1 }
  0xe2   : > { %v898_v10 = vadd.f32 %v897_v6, %v896_v1  ;;  %v1123_v11 = vadd.f32 %v1122_v7, %v1121_v2  ;;  %v1134_v12 = vrot.slane %v1133_v8, 4 }
  0xe3   : > { %v910_v13 = vadd.f32 %v909_v9, %v908_v4 }
  0xe4   : > { %899 = vst.msk [vmem:[%s1981_s5 + $0x2] sm:$0x1] %vm440_vm6, %v898_v10  ;;  %v1124_v14 = vrot.slane %v1123_v11, 2  ;;  %v1135_v15 = vadd.f32 %v1134_v12, %v1133_v8 }
  0xe5   : > { %911 = vst.msk [vmem:[%s1988_s7 + $0x2] sm:$0x1] %vm440_vm6, %v910_v13 }
  0xe6   : > { %v1125_v16 = vadd.f32 %v1124_v14, %v1123_v11  ;;  %v1136_v17 = vrot.slane %v1135_v15, 2 }
  0xe8   : > { %v1126_v18 = vrot.slane %v1125_v16, 1  ;;  %v1137_v19 = vadd.f32 %v1136_v17, %v1135_v15 }
  0xea   : > { %v1127_v21 = vadd.f32 %v1126_v18, %v1125_v16  ;;  %v1138_v22 = vrot.slane %v1137_v19, 1 }
  0xec   : > { %1128 = vst.msk [vmem:[%s1981_s5 + $0x3] sm:$0x1] %vm440_vm6, %v1127_v21  ;;  %v1139_v23 = vadd.f32 %v1138_v22, %v1137_v19 }
  0xee   : > { %1140 = vst.msk [vmem:[%s1988_s7 + $0x3] sm:$0x1] %vm440_vm6, %v1139_v23 }
  0xef PF: > { %s15_s15 = sadd.s32 1, %s1671_s15  }
  0xf0   : > { %p12_p4 = scmp.ge.s32.totalorder %s15_s15, 4  }
  0xf2   :  { %14 = sbr.rel (!%p12_p4) target bundleno = 1 (0x1), region = 96 }

// kernel: subpixel_block_forward.3
= control target key start
LH: loop header
LB: loop body
LE: loop exit
PB: predicated region body
PF: predicated region fallthrough
CT: control target
= control target key end

     0   :  { %s619_s0 = inlined_call_operand.vmem [shape: f32[4], index: 0, kind: input, shape index: {}]   ;;  %s620_s1 = inlined_call_operand.vmem [shape: f32[4], index: 1, kind: input, shape index: {}]   ;;  %s621_s2 = inlined_call_operand.<no memory space> [shape: f32[1], index: 2, kind: input, shape index: {}]   ;;  %s622_s3 = inlined_call_operand.vmem [shape: bf16[2,4,16,64], index: 3, kind: input, shape index: {}]   ;;  %s623_s4 = inlined_call_operand.vmem [shape: f32[2,4,16,64], index: 4, kind: output, shape index: {}]  }
   0x1   :  { %9 = sst [smem:[#allocation2]] %s621_s2 }
   0x2   :  { %10 = vsyncpa [#allocation4], 0 }
   0x3   :  { %11 = vsyncpa [#allocation6], 0  ;;  %s551_s17 = smov 0  }
   0x4 LB: > { %s392_s18 = sadd.s32 4294967295, %s519_s17   ;;  %p394_p0 = scmp.ge.s32.totalorder %s519_s17, 1  ;;  %s519_s17 = sphi %s551_s17, %s17_s17  }
   0x5   : > { %p137_p1 = scmp.lt.s32.totalorder %s519_s17, 3  ;;  %s149_s21 = sshll.u32 %s619_s0, 4  ;;  %s150_s21 = int_to_ptr.vmem [resolvable:$true] %s149_s21 }
   0x6   : > { %p461_p3 = scmp.eq.s32.totalorder %s392_s18, 0  ;;  %s159_s23 = sshll.u32 %s620_s1, 4  ;;  %s160_s23 = int_to_ptr.vmem [resolvable:$true] %s159_s23 }
   0x7   : > { %p138_p2 = pnand %p394_p0, %p137_p1  ;;  %s521_s24 = smov [#allocation3]  }
   0x8   : > { %s522_s25 = smov [#allocation5]  }
   0x9   : > { %p454_p4 = pneg %p138_p2 }
   0xa   : > { %183 = sbr.rel (%p138_p2) target bundleno = 45 (0x2d), region = 36 }
   0xb   : > { %p455_p5 = pnand %p461_p3, %p454_p4 }
   0xd   : > { %457 = dma.vmem_to_smem (!%p455_p5), %s150_s21, 16, %s521_s24, [#allocation4]  }
   0xe   : > { %460 = dma.vmem_to_smem (!%p455_p5), %s160_s23, 16, %s522_s25, [#allocation6]  }
   0xf   : > { %510 = dma.done.wait (%p461_p3), [#allocation4], 16  }
  0x10   : > { %512 = vsyncadd (%p461_p3), [#allocation4], 4294967280 }
  0x11   : > { %514 = dma.done.wait (%p461_p3), [#allocation6], 16  }
  0x12   : > { %516 = vsyncadd (%p461_p3), [#allocation6], 4294967280 }
  0x13   : > { %195 = sfence }
  0x14   : > { %p216_p6 = scmp.lt.s32.totalorder %s392_s18, 1  ;;  %s226_s26 = sld [smem:[#allocation2]]  ;;  %vm246_vm0 = vcmask 523264  }
  0x15   : > { %s231_s27 = sld [smem:[#allocation3]] }
  0x16   : > { %s625_s18 = smov (!%p216_p6, %s392_s18), 1  ;;  %s235_s28 = sld [smem:[#allocation5]] }
  0x17   : > { %s425_s29 = sshll.u32 %s625_s18, 5  ;;  %s576_s7 = sld [smem:[#allocation3 + $0x1]] }
  0x18   : > { %s220_s6 = scalar_lea.vmem %s622_s3, %s425_s29  ;;  %s578_s8 = sld [smem:[#allocation5 + $0x1]] }
  0x19   : > { %v428_v0 = vld [vmem:[%s220_s6] sm:$0xff]   ;;  %v443_v4 = vld [vmem:[%s220_s6 + $0x8] sm:$0xff]   ;;  %v444_v5 = vld [vmem:[%s220_s6 + $0x10] sm:$0xff]   ;;  %s580_s9 = sld [smem:[#allocation3 + $0x2]]  ;;  %s426_s11 = sshll.u32 %s625_s18, 6 }
  0x1a   : > { %v429_v1 = vunpack.c.l.bf16 %v428_v0  ;;  %v430_v3 = vunpack.c.h.bf16 %v428_v0  ;;  %s582_s10 = sld [smem:[#allocation5 + $0x2]]  ;;  %v445_v9 = vld [vmem:[%s220_s6 + $0x18] sm:$0xff]   ;;  %v241_v10 = vstv %s226_s26  ;;  %v433_v11 = vunpack.c.l.bf16 %v443_v4  ;;  %s593_s16 = scalar_lea.vmem %s623_s4, %s426_s11 }
  0x1b   : > { %v232_v2 = vstv %s231_s27  ;;  %v434_v12 = vunpack.c.h.bf16 %v443_v4  ;;  %s585_s12 = sld [smem:[#allocation3 + $0x3]]  ;;  %v437_v15 = vunpack.c.l.bf16 %v444_v5  ;;  %v438_v17 = vunpack.c.h.bf16 %v444_v5 }
  0x1c   : > { %v233_v6 = vmul.f32 %v429_v1, %v232_v2  ;;  %v236_v7 = vstv %s235_s28  ;;  %v234_v8 = vmul.f32 %v430_v3, %v232_v2  ;;  %s587_s13 = sld [smem:[#allocation5 + $0x3]]  ;;  %v441_v18 = vunpack.c.l.bf16 %v445_v9 }
  0x1d   : > { %v255_v16 = vstv %s576_s7  ;;  %v442_v19 = vunpack.c.h.bf16 %v445_v9 }
  0x1e   : > { %v237_v13 = vadd.f32 %v236_v7, %v233_v6  ;;  %v238_v14 = vadd.f32 %v236_v7, %v234_v8  ;;  %v256_v22 = vmul.f32 %v433_v11, %v255_v16  ;;  %v259_v23 = vstv %s578_s8 }
  0x1f   : > { %v257_v24 = vmul.f32 %v434_v12, %v255_v16  ;;  %v277_v25 = vstv %s580_s9 }
  0x20   : > { %vm239_vm1 = vcmp.ge.f32.partialorder %v237_v13, 0.0  ;;  %v242_v20 = vmul.f32 %v241_v10, %v237_v13  ;;  %vm240_vm2 = vcmp.ge.f32.partialorder %v238_v14, 0.0  ;;  %v243_v21 = vmul.f32 %v241_v10, %v238_v14 }
  0x21   : > { %v278_v28 = vmul.f32 %v437_v15, %v277_v25  ;;  %v281_v29 = vstv %s582_s10  ;;  %v260_v30 = vadd.f32 %v259_v23, %v256_v22  ;;  %v261_v31 = vadd.f32 %v259_v23, %v257_v24 }
  0x22   : > { %v244_v26 = vsel %vm239_vm1, %v237_v13, %v242_v20  ;;  %v245_v27 = vsel %vm240_vm2, %v238_v14, %v243_v21  ;;  %v279_v32 = vmul.f32 %v438_v17, %v277_v25  ;;  %v299_v33 = vstv %s585_s12 }
  0x23   : > { %247 = vst.msk [vmem:[%s593_s16] sm:$0xff] %vm246_vm0, %v244_v26  ;;  %v282_v34 = vadd.f32 %v281_v29, %v278_v28  ;;  %v300_v35 = vmul.f32 %v441_v18, %v299_v33  ;;  %v303_v36 = vstv %s587_s13  ;;  %v301_v37 = vmul.f32 %v442_v19, %v299_v33 }
  0x24   : > { %248 = vst.msk [vmem:[%s593_s16 + $0x8] sm:$0xff] %vm246_vm0, %v245_v27  ;;  %vm262_vm3 = vcmp.ge.f32.partialorder %v260_v30, 0.0  ;;  %v264_v38 = vmul.f32 %v260_v30, %v241_v10  ;;  %vm263_vm4 = vcmp.ge.f32.partialorder %v261_v31, 0.0  ;;  %v265_v39 = vmul.f32 %v261_v31, %v241_v10 }
  0x25   : > { %vm284_vm5 = vcmp.ge.f32.partialorder %v282_v34, 0.0  ;;  %v286_v40 = vmul.f32 %v282_v34, %v241_v10  ;;  %v283_v41 = vadd.f32 %v281_v29, %v279_v32  ;;  %v304_v42 = vadd.f32 %v303_v36, %v300_v35 }
  0x26   : > { %v266_v43 = vsel %vm262_vm3, %v260_v30, %v264_v38  ;;  %v267_v44 = vsel %vm263_vm4, %v261_v31, %v265_v39  ;;  %v305_v45 = vadd.f32 %v303_v36, %v301_v37 }
  0x27   : > { %409 = vst.msk [vmem:[%s593_s16 + $0x10] sm:$0xff] %vm246_vm0, %v266_v43  ;;  %v288_v46 = vsel %vm284_vm5, %v282_v34, %v286_v40  ;;  %vm285_vm6 = vcmp.ge.f32.partialorder %v283_v41, 0.0  ;;  %v287_v47 = vmul.f32 %v283_v41, %v241_v10  ;;  %vm306_vm7 = vcmp.ge.f32.partialorder %v304_v42, 0.0 }
  0x28   : > { %410 = vst.msk [vmem:[%s593_s16 + $0x18] sm:$0xff] %vm246_vm0, %v267_v44  ;;  %v308_v48 = vmul.f32 %v304_v42, %v241_v10  ;;  %vm307_vm8 = vcmp.ge.f32.partialorder %v305_v45, 0.0  ;;  %v309_v49 = vmul.f32 %v305_v45, %v241_v10 }
  0x29   : > { %415 = vst.msk [vmem:[%s593_s16 + $0x20] sm:$0xff] %vm246_vm0, %v288_v46  ;;  %v289_v50 = vsel %vm285_vm6, %v283_v41, %v287_v47 }
  0x2a   : > { %416 = vst.msk [vmem:[%s593_s16 + $0x28] sm:$0xff] %vm246_vm0, %v289_v50  ;;  %v310_v51 = vsel %vm306_vm7, %v304_v42, %v308_v48  ;;  %v311_v52 = vsel %vm307_vm8, %v305_v45, %v309_v49 }
  0x2b   : > { %421 = vst.msk [vmem:[%s593_s16 + $0x30] sm:$0xff] %vm246_vm0, %v310_v51 }
  0x2c   : > { %422 = vst.msk [vmem:[%s593_s16 + $0x38] sm:$0xff] %vm246_vm0, %v311_v52 }
  0x2d PF: > { %s17_s17 = sadd.s32 1, %s519_s17  }
  0x2e   : > { %p14_p7 = scmp.ge.s32.totalorder %s17_s17, 4  }
  0x30   :  { %16 = sbr.rel (!%p14_p7) target bundleno = 4 (0x4), region = 81 }
  0x35   :  { %336 = vsyncpa [#allocation4], 1 }
  0x36   :  { %338 = vsyncpa [#allocation4 + $0x1], 1 }
  0x37   :  { %339 = vsyncpa [#allocation6], 1 }

</bundles_post_ra>
